<compile_context>
chip_gen: v6e
topology: v6e:2x2x1
jax: 0.10.0
libtpu: 0.0.40
codegen_flags: <defaults>
</compile_context>

<pallas_src>
import jax
import jax.numpy as jnp
from jax import lax
from jax.experimental import pallas as pl
from jax.experimental.pallas import tpu as pltpu


# ----------------------------------------------------------------------------- #
# Kernel 1: fused masked bidirectional LSTMs (text + aspect in one invocation)
#   Inputs are the *precomputed* input projections xW+b (time-major), so the
#   recurrence only does the h @ W_hh matmul per step.
# ----------------------------------------------------------------------------- #
def bilstm_kernel(xw_t_ref, xw_a_ref, lens_t_ref, lens_a_ref,
                  whf1_ref, whb1_ref, whf2_ref, whb2_ref,
                  vf_ref, vb_ref, ef_ref, eb_ref,
                  h_ref, c_ref):
    # xw_t_ref: (L,  B, 8*HD)   [fwd gates | bwd gates] already include x@W_ih + b
    # xw_a_ref: (La, B, 8*HD)
    # lens_*:   (B, 1) int32
    # wh*:      (HD, 4*HD)
    # vf/vb:    (L,  B, HD)   per-direction text outputs
    # ef/eb:    (La, B, HD)   per-direction aspect outputs
    HD = h_ref.shape[1]
    lens_t = lens_t_ref[...]
    lens_a = lens_a_ref[...]

    def run_dir(T, xw_ref, col0, wh_ref, lens, o_ref, reverse):
        h_ref[...] = jnp.zeros_like(h_ref)
        c_ref[...] = jnp.zeros_like(c_ref)
        wh = wh_ref[...]

        def body(k, carry):
            t = (T - 1 - k) if reverse else k
            pre = xw_ref[t]                                     # (B, 8*HD)
            gates = (pre[:, col0:col0 + 4 * HD]
                     + jnp.dot(h_ref[...], wh,
                               preferred_element_type=jnp.float32))  # (B, 4*HD)
            ig = jax.nn.sigmoid(gates[:, 0:HD])
            fg = jax.nn.sigmoid(gates[:, HD:2 * HD])
            gg = jnp.tanh(gates[:, 2 * HD:3 * HD])
            og = jax.nn.sigmoid(gates[:, 3 * HD:4 * HD])
            c_new = fg * c_ref[...] + ig * gg
            h_new = og * jnp.tanh(c_new)
            mask = lens > t                                     # (B, 1)
            h_ref[...] = jnp.where(mask, h_new, h_ref[...])
            c_ref[...] = jnp.where(mask, c_new, c_ref[...])
            o_ref[t] = jnp.where(mask, h_new, 0.0)
            return carry

        lax.fori_loop(0, T, body, 0)

    L = xw_t_ref.shape[0]
    La = xw_a_ref.shape[0]
    # text LSTM
    run_dir(L, xw_t_ref, 0, whf1_ref, lens_t, vf_ref, False)
    run_dir(L, xw_t_ref, 4 * HD, whb1_ref, lens_t, vb_ref, True)
    # aspect LSTM
    run_dir(La, xw_a_ref, 0, whf2_ref, lens_a, ef_ref, False)
    run_dir(La, xw_a_ref, 4 * HD, whb2_ref, lens_a, eb_ref, True)


def bilstm_pair(xw_t, xw_a, lens_t, lens_a, whf1, whb1, whf2, whb2):
    """xw_t: (L,B,8HD), xw_a: (La,B,8HD) -> 4 arrays (L,B,HD)x2, (La,B,HD)x2."""
    L, B, H8 = xw_t.shape
    La = xw_a.shape[0]
    HD = H8 // 8
    vmem = pltpu.MemorySpace.VMEM
    return pl.pallas_call(
        bilstm_kernel,
        out_shape=(jax.ShapeDtypeStruct((L, B, HD), jnp.float32),
                   jax.ShapeDtypeStruct((L, B, HD), jnp.float32),
                   jax.ShapeDtypeStruct((La, B, HD), jnp.float32),
                   jax.ShapeDtypeStruct((La, B, HD), jnp.float32)),
        in_specs=[pl.BlockSpec(memory_space=vmem)] * 8,
        out_specs=(pl.BlockSpec(memory_space=vmem),) * 4,
        scratch_shapes=[pltpu.VMEM((B, HD), jnp.float32),
                        pltpu.VMEM((B, HD), jnp.float32)],
        compiler_params=pltpu.CompilerParams(
            vmem_limit_bytes=64 * 1024 * 1024),
    )(xw_t, xw_a, lens_t, lens_a, whf1, whb1, whf2, whb2)


# ----------------------------------------------------------------------------- #
# Kernel 2: fused CPT (2 iterations) + Conv1d(k=3,pad=1) + ReLU + global max-pool
#   One grid step per batch element ("parallel" for v7x megacore); v never
#   leaves VMEM between the CPT loop and the convolution.
# ----------------------------------------------------------------------------- #
def cpt_conv_kernel(v_ref, e_ref, pos_ref, wa_ref, wv_ref, fb_ref,
                    wc_ref, bc_ref, out_ref):
    # v_ref: (L, 2HD), e_ref: (La, 2HD), pos_ref: (L, 1)
    # wa/wv: (2HD, 2HD)  (split + transposed fc1.weight), fb: (1, 2HD)
    # wc:    (6HD, CO)   (3 conv taps folded), bc: (1, CO), out_ref: (1, CO)
    v = v_ref[...]
    e = e_ref[...]
    pos = pos_ref[...]
    wa = wa_ref[...]
    wv = wv_ref[...]
    fb = fb_ref[...]

    for _ in range(2):
        # att[l, a] = sum_c v[l, c] * e[a, c]   (no transpose materialized)
        att = lax.dot_general(v, e, (((1,), (1,)), ((), ())),
                              preferred_element_type=jnp.float32)   # (L, La)
        att = att - jnp.max(att, axis=1, keepdims=True)             # softmax over La
        att = jnp.exp(att)
        att = att / jnp.sum(att, axis=1, keepdims=True)
        aspect_mid = jnp.dot(att, e,
                             preferred_element_type=jnp.float32)    # (L, 2HD)
        proj = jnp.maximum(
            jnp.dot(aspect_mid, wa, preferred_element_type=jnp.float32)
            + jnp.dot(v, wv, preferred_element_type=jnp.float32)
            + fb, 0.0)                                              # (L, 2HD)
        v = (proj + v) * pos                                        # residual + position

    # Conv1d(2HD -> CO, k=3, pad=1) as ONE matmul over stacked shifted rows.
    L, C2 = v.shape
    zrow = jnp.zeros((1, C2), v.dtype)
    v_m1 = jnp.concatenate([zrow, v[:L - 1, :]], axis=0)            # x[l-1]
    v_p1 = jnp.concatenate([v[1:, :], zrow], axis=0)                # x[l+1]
    stacked = jnp.concatenate([v_m1, v, v_p1], axis=1)              # (L, 6HD)
    z = jnp.maximum(
        jnp.dot(stacked, wc_ref[...], preferred_element_type=jnp.float32)
        + bc_ref[...], 0.0)                                         # (L, CO)
    out_ref[...] = jnp.max(z, axis=0, keepdims=True)                # (1, CO)


def cpt_conv_pool(v, e, pos, wa, wv, fb, wc, bc):
    """v: (B,L,2HD), e: (B,La,2HD), pos: (B,L,1) -> (B, CO)."""
    B, L, C2 = v.shape
    La = e.shape[1]
    C6, CO = wc.shape
    out = pl.pallas_call(
        cpt_conv_kernel,
        out_shape=jax.ShapeDtypeStruct((B, 1, CO), jnp.float32),
        grid=(B,),
        in_specs=[
            pl.BlockSpec((None, L, C2), lambda b: (b, 0, 0)),
            pl.BlockSpec((None, La, C2), lambda b: (b, 0, 0)),
            pl.BlockSpec((None, L, 1), lambda b: (b, 0, 0)),
            pl.BlockSpec((C2, C2), lambda b: (0, 0)),
            pl.BlockSpec((C2, C2), lambda b: (0, 0)),
            pl.BlockSpec((1, C2), lambda b: (0, 0)),
            pl.BlockSpec((C6, CO), lambda b: (0, 0)),
            pl.BlockSpec((1, CO), lambda b: (0, 0)),
        ],
        out_specs=pl.BlockSpec((None, 1, CO), lambda b: (b, 0, 0)),
        compiler_params=pltpu.CompilerParams(
            dimension_semantics=("parallel",),
            vmem_limit_bytes=64 * 1024 * 1024),
    )(v, e, pos, wa, wv, fb, wc, bc)
    return out.reshape(B, CO)


# ----------------------------------------------------------------------------- #
# Plain-JAX glue
# ----------------------------------------------------------------------------- #
def position_weight(aspect_in_text, seq_len):
    """Absolute_Position_Embedding.weight_matrix, vectorized. -> (B, L) float32."""
    j = jnp.arange(seq_len, dtype=jnp.float32)[None, :]
    start = aspect_in_text[:, 0:1].astype(jnp.float32)
    end = aspect_in_text[:, 1:2].astype(jnp.float32)
    w_before = 1.0 - (end - j) / 40.0      # j < end : relative = end - j
    w_after = 1.0 - (j - start) / 40.0     # j >= end: relative = j - start
    return jnp.where(j < end, w_before, w_after)


def tnet_lf_unit_forward(params, text_raw_indices, aspect_indices, aspect_in_text):
    B, L = text_raw_indices.shape
    feature_len = jnp.sum(text_raw_indices != 0, axis=-1).astype(jnp.int32).reshape(B, 1)
    aspect_len = jnp.sum(aspect_indices != 0, axis=-1).astype(jnp.int32).reshape(B, 1)

    emb = params["embedding"]
    feature = emb[text_raw_indices]        # (B, L, D)   embedding gather (glue)
    aspect = emb[aspect_indices]           # (B, La, D)

    # Hoisted LSTM input projections: one big matmul per LSTM (fwd|bwd packed),
    # emitted time-major so the recurrence kernel only carries h @ W_hh.
    l1, l2 = params["lstm1"], params["lstm2"]
    xw_t = jnp.einsum("bld,dh->lbh", feature, l1["w_ih"]) + l1["b"]   # (L,  B, 8HD)
    xw_a = jnp.einsum("bld,dh->lbh", aspect, l2["w_ih"]) + l2["b"]    # (La, B, 8HD)

    vf, vb, ef, eb = bilstm_pair(xw_t, xw_a, feature_len, aspect_len,
                                 l1["w_hh_f"], l1["w_hh_b"],
                                 l2["w_hh_f"], l2["w_hh_b"])

    # single cheap relayout to batch-major, row-major (L, 2HD) layout used by CPT
    v = jnp.transpose(jnp.concatenate([vf, vb], axis=-1), (1, 0, 2))  # (B, L, 2HD)
    e = jnp.transpose(jnp.concatenate([ef, eb], axis=-1), (1, 0, 2))  # (B, La, 2HD)

    pos = position_weight(aspect_in_text, L)[..., None]               # (B, L, 1)

    z = cpt_conv_pool(v, e, pos,
                      params["wa"], params["wv"], params["fb"],
                      params["wc"], params["bc"])                     # (B, 50)
    return z


def init_params(key, V, D, HD, CO=50):
    ks = jax.random.split(key, 8)

    def nrm(k, shape, scale=0.1):
        return jax.random.normal(k, shape, dtype=jnp.float32) * scale

    def lstm_params(kbase):
        kk = jax.random.split(kbase, 6)
        w_ih_f = nrm(kk[0], (D, 4 * HD))
        w_hh_f = nrm(kk[1], (HD, 4 * HD))
        b_f = nrm(kk[2], (1, 4 * HD))
        w_ih_b = nrm(kk[3], (D, 4 * HD))
        w_hh_b = nrm(kk[4], (HD, 4 * HD))
        b_b = nrm(kk[5], (1, 4 * HD))
        return dict(
            w_ih=jnp.concatenate([w_ih_f, w_ih_b], axis=1),   # (D, 8HD)  [fwd|bwd]
            b=jnp.concatenate([b_f, b_b], axis=1),            # (1, 8HD)
            w_hh_f=w_hh_f, w_hh_b=w_hh_b,
        )

    emb = nrm(ks[0], (V, D), 0.5)
    emb = emb.at[0].set(0.0)               # padding row

    fc1_w = nrm(ks[3], (2 * HD, 4 * HD))   # PyTorch Linear(4HD -> 2HD).weight
    fc1_b = nrm(ks[4], (1, 2 * HD))
    conv_w = nrm(ks[5], (CO, 2 * HD, 3))   # PyTorch Conv1d weight (CO, C_in, k)
    conv_b = nrm(ks[6], (1, CO))

    return dict(
        embedding=emb,
        lstm1=lstm_params(ks[1]),
        lstm2=lstm_params(ks[2]),
        # fc1 split host-side so the CPT kernel avoids the (4HD, L) concat:
        wa=jnp.transpose(fc1_w[:, :2 * HD]),          # (2HD, 2HD) acts on aspect_mid
        wv=jnp.transpose(fc1_w[:, 2 * HD:]),          # (2HD, 2HD) acts on v
        fb=fc1_b,                                     # (1, 2HD)
        # 3 conv taps folded into one (6HD, CO) matmul operand:
        wc=jnp.transpose(conv_w, (2, 1, 0)).reshape(3 * 2 * HD, CO),
        bc=conv_b,                                    # (1, CO)
    )


if __name__ == "__main__":
    key = jax.random.PRNGKey(0)
    k_params, k_text, k_asp = jax.random.split(key, 3)

    V, D, HD = 20, 32, 32
    B, L, La = 2, 8, 4

    params = init_params(k_params, V, D, HD)

    # text lengths [8, 6]; aspect lengths [4, 2] (La = batch max aspect length,
    # matching DynamicLSTM's pad_packed_sequence output length)
    text_idx = jax.random.randint(k_text, (B, L), 1, V, dtype=jnp.int32)
    text_lens = jnp.array([8, 6], dtype=jnp.int32)
    text_idx = jnp.where(jnp.arange(L)[None, :] < text_lens[:, None], text_idx, 0)

    aspect_idx = jax.random.randint(k_asp, (B, La), 1, V, dtype=jnp.int32)
    aspect_lens = jnp.array([4, 2], dtype=jnp.int32)
    aspect_idx = jnp.where(jnp.arange(La)[None, :] < aspect_lens[:, None], aspect_idx, 0)

    aspect_in_text = jnp.array([[2, 5], [1, 3]], dtype=jnp.int32)  # [start, end] per batch

    fwd = jax.jit(tnet_lf_unit_forward)
    z = fwd(params, text_idx, aspect_idx, aspect_in_text)
    z = jax.block_until_ready(z)
    assert z.shape == (B, 50) and z.dtype == jnp.float32
    print("KERNEL_OK")
</pallas_src>

<mosaic_0001>
module attributes {stable_mosaic.version = 11 : i64} {
  func.func @cpt_conv_kernel(%arg0: i32, %arg1: memref<1x8x64xf32, #tpu.memory_space<vmem>>, %arg2: memref<1x4x64xf32, #tpu.memory_space<vmem>>, %arg3: memref<1x8x1xf32, #tpu.memory_space<vmem>>, %arg4: memref<64x64xf32, #tpu.memory_space<vmem>>, %arg5: memref<64x64xf32, #tpu.memory_space<vmem>>, %arg6: memref<1x64xf32, #tpu.memory_space<vmem>>, %arg7: memref<192x50xf32, #tpu.memory_space<vmem>>, %arg8: memref<1x50xf32, #tpu.memory_space<vmem>>, %arg9: memref<1x1x50xf32, #tpu.memory_space<vmem>>) attributes {dimension_semantics = [#tpu.dimension_semantics<parallel>], iteration_bounds = array<i64: 2>, scalar_prefetch = 0 : i64, scratch_operands = 0 : i64, tpu.core_type = #tpu.core_type<tc>, window_params = [{transform_indices = @transform_0, window_bounds = array<i64: 1, 8, 64>}, {transform_indices = @transform_1, window_bounds = array<i64: 1, 4, 64>}, {transform_indices = @transform_2, window_bounds = array<i64: 1, 8, 1>}, {pipeline_mode = #tpu.pipeline_mode<synchronous>, transform_indices = @transform_3, window_bounds = array<i64: 64, 64>}, {pipeline_mode = #tpu.pipeline_mode<synchronous>, transform_indices = @transform_4, window_bounds = array<i64: 64, 64>}, {pipeline_mode = #tpu.pipeline_mode<synchronous>, transform_indices = @transform_5, window_bounds = array<i64: 1, 64>}, {pipeline_mode = #tpu.pipeline_mode<synchronous>, transform_indices = @transform_6, window_bounds = array<i64: 192, 50>}, {pipeline_mode = #tpu.pipeline_mode<synchronous>, transform_indices = @transform_7, window_bounds = array<i64: 1, 50>}, {transform_indices = @transform_8, window_bounds = array<i64: 1, 1, 50>}]} {
    %c0 = arith.constant 0 : index
    %c0_0 = arith.constant 0 : index
    %c0_1 = arith.constant 0 : index
    %0 = vector.load %arg1[%c0, %c0_0, %c0_1] : memref<1x8x64xf32, #tpu.memory_space<vmem>>, vector<1x8x64xf32>
    %1 = vector.shape_cast %0 : vector<1x8x64xf32> to vector<8x64xf32>
    %c0_2 = arith.constant 0 : index
    %c0_3 = arith.constant 0 : index
    %c0_4 = arith.constant 0 : index
    %2 = vector.load %arg2[%c0_2, %c0_3, %c0_4] : memref<1x4x64xf32, #tpu.memory_space<vmem>>, vector<1x4x64xf32>
    %3 = vector.shape_cast %2 : vector<1x4x64xf32> to vector<4x64xf32>
    %c0_5 = arith.constant 0 : index
    %c0_6 = arith.constant 0 : index
    %c0_7 = arith.constant 0 : index
    %4 = vector.load %arg3[%c0_5, %c0_6, %c0_7] : memref<1x8x1xf32, #tpu.memory_space<vmem>>, vector<1x8x1xf32>
    %5 = vector.shape_cast %4 : vector<1x8x1xf32> to vector<8x1xf32>
    %c0_8 = arith.constant 0 : index
    %c0_9 = arith.constant 0 : index
    %6 = vector.load %arg4[%c0_8, %c0_9] : memref<64x64xf32, #tpu.memory_space<vmem>>, vector<64x64xf32>
    %c0_10 = arith.constant 0 : index
    %c0_11 = arith.constant 0 : index
    %7 = vector.load %arg5[%c0_10, %c0_11] : memref<64x64xf32, #tpu.memory_space<vmem>>, vector<64x64xf32>
    %c0_12 = arith.constant 0 : index
    %c0_13 = arith.constant 0 : index
    %8 = vector.load %arg6[%c0_12, %c0_13] : memref<1x64xf32, #tpu.memory_space<vmem>>, vector<1x64xf32>
    %cst = arith.constant dense<0.000000e+00> : vector<8x4xf32>
    %9 = tpu.matmul %1, %3, %cst {dimension_numbers = #tpu.dot_dimension_numbers<[1], [1], [0], [0], [0, 0, 1, 0], [], []>} : vector<8x64xf32>, vector<4x64xf32>, vector<8x4xf32> -> vector<8x4xf32>
    %cst_14 = arith.constant dense<0xFF800000> : vector<8xf32>
    %10 = vector.multi_reduction <maximumf>, %9, %cst_14 [1] : vector<8x4xf32> to vector<8xf32>
    %11 = vector.shape_cast %10 : vector<8xf32> to vector<8x1xf32>
    %12 = vector.broadcast %11 : vector<8x1xf32> to vector<8x4xf32>
    %13 = arith.subf %9, %12 : vector<8x4xf32>
    %14 = math.exp %13 : vector<8x4xf32>
    %cst_15 = arith.constant dense<0.000000e+00> : vector<8xf32>
    %15 = vector.multi_reduction <add>, %14, %cst_15 [1] : vector<8x4xf32> to vector<8xf32>
    %16 = vector.shape_cast %15 : vector<8xf32> to vector<8x1xf32>
    %17 = vector.broadcast %16 : vector<8x1xf32> to vector<8x4xf32>
    %18 = arith.divf %14, %17 : vector<8x4xf32>
    %cst_16 = arith.constant dense<0.000000e+00> : vector<8x64xf32>
    %19 = tpu.matmul %18, %3, %cst_16 {dimension_numbers = #tpu.dot_dimension_numbers<[1], [0], [0], [1], [0, 0, 1, 1], [], []>} : vector<8x4xf32>, vector<4x64xf32>, vector<8x64xf32> -> vector<8x64xf32>
    %cst_17 = arith.constant dense<0.000000e+00> : vector<8x64xf32>
    %20 = tpu.matmul %19, %6, %cst_17 {dimension_numbers = #tpu.dot_dimension_numbers<[1], [0], [0], [1], [0, 0, 1, 1], [], []>} : vector<8x64xf32>, vector<64x64xf32>, vector<8x64xf32> -> vector<8x64xf32>
    %cst_18 = arith.constant dense<0.000000e+00> : vector<8x64xf32>
    %21 = tpu.matmul %1, %7, %cst_18 {dimension_numbers = #tpu.dot_dimension_numbers<[1], [0], [0], [1], [0, 0, 1, 1], [], []>} : vector<8x64xf32>, vector<64x64xf32>, vector<8x64xf32> -> vector<8x64xf32>
    %22 = arith.addf %20, %21 : vector<8x64xf32>
    %23 = vector.broadcast %8 : vector<1x64xf32> to vector<8x64xf32>
    %24 = arith.addf %22, %23 : vector<8x64xf32>
    %cst_19 = arith.constant 0.000000e+00 : f32
    %25 = vector.broadcast %cst_19 : f32 to vector<8x64xf32>
    %26 = arith.maximumf %24, %25 : vector<8x64xf32>
    %27 = arith.addf %26, %1 : vector<8x64xf32>
    %28 = vector.broadcast %5 : vector<8x1xf32> to vector<8x64xf32>
    %29 = arith.mulf %27, %28 : vector<8x64xf32>
    %cst_20 = arith.constant dense<0.000000e+00> : vector<8x4xf32>
    %30 = tpu.matmul %29, %3, %cst_20 {dimension_numbers = #tpu.dot_dimension_numbers<[1], [1], [0], [0], [0, 0, 1, 0], [], []>} : vector<8x64xf32>, vector<4x64xf32>, vector<8x4xf32> -> vector<8x4xf32>
    %cst_21 = arith.constant dense<0xFF800000> : vector<8xf32>
    %31 = vector.multi_reduction <maximumf>, %30, %cst_21 [1] : vector<8x4xf32> to vector<8xf32>
    %32 = vector.shape_cast %31 : vector<8xf32> to vector<8x1xf32>
    %33 = vector.broadcast %32 : vector<8x1xf32> to vector<8x4xf32>
    %34 = arith.subf %30, %33 : vector<8x4xf32>
    %35 = math.exp %34 : vector<8x4xf32>
    %cst_22 = arith.constant dense<0.000000e+00> : vector<8xf32>
    %36 = vector.multi_reduction <add>, %35, %cst_22 [1] : vector<8x4xf32> to vector<8xf32>
    %37 = vector.shape_cast %36 : vector<8xf32> to vector<8x1xf32>
    %38 = vector.broadcast %37 : vector<8x1xf32> to vector<8x4xf32>
    %39 = arith.divf %35, %38 : vector<8x4xf32>
    %cst_23 = arith.constant dense<0.000000e+00> : vector<8x64xf32>
    %40 = tpu.matmul %39, %3, %cst_23 {dimension_numbers = #tpu.dot_dimension_numbers<[1], [0], [0], [1], [0, 0, 1, 1], [], []>} : vector<8x4xf32>, vector<4x64xf32>, vector<8x64xf32> -> vector<8x64xf32>
    %cst_24 = arith.constant dense<0.000000e+00> : vector<8x64xf32>
    %41 = tpu.matmul %40, %6, %cst_24 {dimension_numbers = #tpu.dot_dimension_numbers<[1], [0], [0], [1], [0, 0, 1, 1], [], []>} : vector<8x64xf32>, vector<64x64xf32>, vector<8x64xf32> -> vector<8x64xf32>
    %cst_25 = arith.constant dense<0.000000e+00> : vector<8x64xf32>
    %42 = tpu.matmul %29, %7, %cst_25 {dimension_numbers = #tpu.dot_dimension_numbers<[1], [0], [0], [1], [0, 0, 1, 1], [], []>} : vector<8x64xf32>, vector<64x64xf32>, vector<8x64xf32> -> vector<8x64xf32>
    %43 = arith.addf %41, %42 : vector<8x64xf32>
    %44 = vector.broadcast %8 : vector<1x64xf32> to vector<8x64xf32>
    %45 = arith.addf %43, %44 : vector<8x64xf32>
    %cst_26 = arith.constant 0.000000e+00 : f32
    %46 = vector.broadcast %cst_26 : f32 to vector<8x64xf32>
    %47 = arith.maximumf %45, %46 : vector<8x64xf32>
    %48 = arith.addf %47, %29 : vector<8x64xf32>
    %49 = vector.broadcast %5 : vector<8x1xf32> to vector<8x64xf32>
    %50 = arith.mulf %48, %49 : vector<8x64xf32>
    %cst_27 = arith.constant 0.000000e+00 : f32
    %51 = vector.broadcast %cst_27 : f32 to vector<1x64xf32>
    %52 = vector.extract_strided_slice %50 {offsets = [0, 0], sizes = [7, 64], strides = [1, 1]} : vector<8x64xf32> to vector<7x64xf32>
    %53 = tpu.concatenate %51, %52 in 0 : vector<1x64xf32>, vector<7x64xf32> -> vector<8x64xf32>
    %54 = vector.extract_strided_slice %50 {offsets = [1, 0], sizes = [7, 64], strides = [1, 1]} : vector<8x64xf32> to vector<7x64xf32>
    %55 = tpu.concatenate %54, %51 in 0 : vector<7x64xf32>, vector<1x64xf32> -> vector<8x64xf32>
    %56 = tpu.concatenate %53, %50, %55 in 1 : vector<8x64xf32>, vector<8x64xf32>, vector<8x64xf32> -> vector<8x192xf32>
    %c0_28 = arith.constant 0 : index
    %c0_29 = arith.constant 0 : index
    %57 = vector.load %arg7[%c0_28, %c0_29] : memref<192x50xf32, #tpu.memory_space<vmem>>, vector<192x50xf32>
    %cst_30 = arith.constant dense<0.000000e+00> : vector<8x50xf32>
    %58 = tpu.matmul %56, %57, %cst_30 {dimension_numbers = #tpu.dot_dimension_numbers<[1], [0], [0], [1], [0, 0, 1, 1], [], []>} : vector<8x192xf32>, vector<192x50xf32>, vector<8x50xf32> -> vector<8x50xf32>
    %c0_31 = arith.constant 0 : index
    %c0_32 = arith.constant 0 : index
    %59 = vector.load %arg8[%c0_31, %c0_32] : memref<1x50xf32, #tpu.memory_space<vmem>>, vector<1x50xf32>
    %60 = vector.broadcast %59 : vector<1x50xf32> to vector<8x50xf32>
    %61 = arith.addf %58, %60 : vector<8x50xf32>
    %cst_33 = arith.constant 0.000000e+00 : f32
    %62 = vector.broadcast %cst_33 : f32 to vector<8x50xf32>
    %63 = arith.maximumf %61, %62 : vector<8x50xf32>
    %cst_34 = arith.constant dense<0xFF800000> : vector<50xf32>
    %64 = vector.multi_reduction <maximumf>, %63, %cst_34 [0] : vector<8x50xf32> to vector<50xf32>
    %65 = vector.shape_cast %64 : vector<50xf32> to vector<1x50xf32>
    %c0_35 = arith.constant 0 : index
    %c0_36 = arith.constant 0 : index
    %c0_37 = arith.constant 0 : index
    %66 = vector.load %arg9[%c0_35, %c0_36, %c0_37] : memref<1x1x50xf32, #tpu.memory_space<vmem>>, vector<1x1x50xf32>
    %67 = vector.shape_cast %66 : vector<1x1x50xf32> to vector<1x50xf32>
    %68 = vector.shape_cast %65 : vector<1x50xf32> to vector<1x1x50xf32>
    tpu.vector_store %arg9[%c0_35, %c0_36, %c0_37], %68 {strides = array<i32>} : memref<1x1x50xf32, #tpu.memory_space<vmem>>, vector<1x1x50xf32>,
    return
  }
  func.func @transform_0(%arg0: i32) -> (i32, i32, i32) {
    %c0_i32 = arith.constant 0 : i32
    %c0_i32_0 = arith.constant 0 : i32
    %c0_i32_1 = arith.constant 0 : i32
    return %arg0, %c0_i32, %c0_i32_0 : i32, i32, i32
  }
  func.func @transform_1(%arg0: i32) -> (i32, i32, i32) {
    %c0_i32 = arith.constant 0 : i32
    %c0_i32_0 = arith.constant 0 : i32
    %c0_i32_1 = arith.constant 0 : i32
    return %arg0, %c0_i32, %c0_i32_0 : i32, i32, i32
  }
  func.func @transform_2(%arg0: i32) -> (i32, i32, i32) {
    %c0_i32 = arith.constant 0 : i32
    %c0_i32_0 = arith.constant 0 : i32
    %c0_i32_1 = arith.constant 0 : i32
    return %arg0, %c0_i32, %c0_i32_0 : i32, i32, i32
  }
  func.func @transform_3(%arg0: i32) -> (i32, i32) {
    %c0_i32 = arith.constant 0 : i32
    %c0_i32_0 = arith.constant 0 : i32
    %c0_i32_1 = arith.constant 0 : i32
    return %c0_i32, %c0_i32_0 : i32, i32
  }
  func.func @transform_4(%arg0: i32) -> (i32, i32) {
    %c0_i32 = arith.constant 0 : i32
    %c0_i32_0 = arith.constant 0 : i32
    %c0_i32_1 = arith.constant 0 : i32
    return %c0_i32, %c0_i32_0 : i32, i32
  }
  func.func @transform_5(%arg0: i32) -> (i32, i32) {
    %c0_i32 = arith.constant 0 : i32
    %c0_i32_0 = arith.constant 0 : i32
    %c0_i32_1 = arith.constant 0 : i32
    return %c0_i32, %c0_i32_0 : i32, i32
  }
  func.func @transform_6(%arg0: i32) -> (i32, i32) {
    %c0_i32 = arith.constant 0 : i32
    %c0_i32_0 = arith.constant 0 : i32
    %c0_i32_1 = arith.constant 0 : i32
    return %c0_i32, %c0_i32_0 : i32, i32
  }
  func.func @transform_7(%arg0: i32) -> (i32, i32) {
    %c0_i32 = arith.constant 0 : i32
    %c0_i32_0 = arith.constant 0 : i32
    %c0_i32_1 = arith.constant 0 : i32
    return %c0_i32, %c0_i32_0 : i32, i32
  }
  func.func @transform_8(%arg0: i32) -> (i32, i32, i32) {
    %c0_i32 = arith.constant 0 : i32
    %c0_i32_0 = arith.constant 0 : i32
    %c0_i32_1 = arith.constant 0 : i32
    return %arg0, %c0_i32, %c0_i32_0 : i32, i32, i32
  }
}

module attributes {stable_mosaic.version = 11 : i64} {
  func.func @bilstm_kernel(%arg0: memref<8x2x256xf32, #tpu.memory_space<vmem>>, %arg1: memref<4x2x256xf32, #tpu.memory_space<vmem>>, %arg2: memref<2x1xi32, #tpu.memory_space<vmem>>, %arg3: memref<2x1xi32, #tpu.memory_space<vmem>>, %arg4: memref<32x128xf32, #tpu.memory_space<vmem>>, %arg5: memref<32x128xf32, #tpu.memory_space<vmem>>, %arg6: memref<32x128xf32, #tpu.memory_space<vmem>>, %arg7: memref<32x128xf32, #tpu.memory_space<vmem>>, %arg8: memref<8x2x32xf32, #tpu.memory_space<vmem>>, %arg9: memref<8x2x32xf32, #tpu.memory_space<vmem>>, %arg10: memref<4x2x32xf32, #tpu.memory_space<vmem>>, %arg11: memref<4x2x32xf32, #tpu.memory_space<vmem>>, %arg12: memref<2x32xf32, #tpu.memory_space<vmem>>, %arg13: memref<2x32xf32, #tpu.memory_space<vmem>>) attributes {dimension_semantics = [], scalar_prefetch = 0 : i64, scratch_operands = 2 : i64, tpu.core_type = #tpu.core_type<tc>} {
    %c0 = arith.constant 0 : index
    %c0_0 = arith.constant 0 : index
    %0 = vector.load %arg2[%c0, %c0_0] : memref<2x1xi32, #tpu.memory_space<vmem>>, vector<2x1xi32>
    %c0_1 = arith.constant 0 : index
    %c0_2 = arith.constant 0 : index
    %1 = vector.load %arg3[%c0_1, %c0_2] : memref<2x1xi32, #tpu.memory_space<vmem>>, vector<2x1xi32>
    %cst = arith.constant 0.000000e+00 : f32
    %2 = vector.broadcast %cst : f32 to vector<2x32xf32>
    %c0_3 = arith.constant 0 : index
    %c0_4 = arith.constant 0 : index
    %3 = vector.load %arg12[%c0_3, %c0_4] : memref<2x32xf32, #tpu.memory_space<vmem>>, vector<2x32xf32>
    tpu.vector_store %arg12[%c0_3, %c0_4], %2 {strides = array<i32>} : memref<2x32xf32, #tpu.memory_space<vmem>>, vector<2x32xf32>,
    %cst_5 = arith.constant 0.000000e+00 : f32
    %4 = vector.broadcast %cst_5 : f32 to vector<2x32xf32>
    %c0_6 = arith.constant 0 : index
    %c0_7 = arith.constant 0 : index
    %5 = vector.load %arg13[%c0_6, %c0_7] : memref<2x32xf32, #tpu.memory_space<vmem>>, vector<2x32xf32>
    tpu.vector_store %arg13[%c0_6, %c0_7], %4 {strides = array<i32>} : memref<2x32xf32, #tpu.memory_space<vmem>>, vector<2x32xf32>,
    %c0_8 = arith.constant 0 : index
    %c0_9 = arith.constant 0 : index
    %6 = vector.load %arg4[%c0_8, %c0_9] : memref<32x128xf32, #tpu.memory_space<vmem>>, vector<32x128xf32>
    %c0_i32 = arith.constant 0 : i32
    %c8_i32 = arith.constant 8 : i32
    %7 = arith.addi %c0_i32, %c8_i32 : i32
    %c1_i32 = arith.constant 1 : i32
    scf.for %arg14 = %c0_i32 to %7 step %c1_i32  : i32 {
      %26 = arith.index_cast %arg14 : i32 to index
      %c0_46 = arith.constant 0 : index
      %c0_47 = arith.constant 0 : index
      %27 = vector.load %arg0[%26, %c0_46, %c0_47] : memref<8x2x256xf32, #tpu.memory_space<vmem>>, vector<1x2x256xf32>
      %28 = vector.shape_cast %27 : vector<1x2x256xf32> to vector<2x256xf32>
      %29 = vector.extract_strided_slice %28 {offsets = [0, 0], sizes = [2, 128], strides = [1, 1]} : vector<2x256xf32> to vector<2x128xf32>
      %c0_48 = arith.constant 0 : index
      %c0_49 = arith.constant 0 : index
      %30 = vector.load %arg12[%c0_48, %c0_49] : memref<2x32xf32, #tpu.memory_space<vmem>>, vector<2x32xf32>
      %cst_50 = arith.constant dense<0.000000e+00> : vector<2x128xf32>
      %31 = tpu.matmul %30, %6, %cst_50 {dimension_numbers = #tpu.dot_dimension_numbers<[1], [0], [0], [1], [0, 0, 1, 1], [], []>} : vector<2x32xf32>, vector<32x128xf32>, vector<2x128xf32> -> vector<2x128xf32>
      %32 = arith.addf %29, %31 : vector<2x128xf32>
      %33 = vector.extract_strided_slice %32 {offsets = [0, 0], sizes = [2, 32], strides = [1, 1]} : vector<2x128xf32> to vector<2x32xf32>
      %34 = arith.negf %33 : vector<2x32xf32>
      %35 = math.exp %34 : vector<2x32xf32>
      %cst_51 = arith.constant 1.000000e+00 : f32
      %36 = vector.broadcast %cst_51 : f32 to vector<2x32xf32>
      %37 = arith.addf %36, %35 : vector<2x32xf32>
      %38 = arith.divf %36, %37 : vector<2x32xf32>
      %39 = vector.extract_strided_slice %32 {offsets = [0, 32], sizes = [2, 32], strides = [1, 1]} : vector<2x128xf32> to vector<2x32xf32>
      %40 = arith.negf %39 : vector<2x32xf32>
      %41 = math.exp %40 : vector<2x32xf32>
      %cst_52 = arith.constant 1.000000e+00 : f32
      %42 = vector.broadcast %cst_52 : f32 to vector<2x32xf32>
      %43 = arith.addf %42, %41 : vector<2x32xf32>
      %44 = arith.divf %42, %43 : vector<2x32xf32>
      %45 = vector.extract_strided_slice %32 {offsets = [0, 64], sizes = [2, 32], strides = [1, 1]} : vector<2x128xf32> to vector<2x32xf32>
      %46 = math.tanh %45 : vector<2x32xf32>
      %47 = vector.extract_strided_slice %32 {offsets = [0, 96], sizes = [2, 32], strides = [1, 1]} : vector<2x128xf32> to vector<2x32xf32>
      %48 = arith.negf %47 : vector<2x32xf32>
      %49 = math.exp %48 : vector<2x32xf32>
      %cst_53 = arith.constant 1.000000e+00 : f32
      %50 = vector.broadcast %cst_53 : f32 to vector<2x32xf32>
      %51 = arith.addf %50, %49 : vector<2x32xf32>
      %52 = arith.divf %50, %51 : vector<2x32xf32>
      %c0_54 = arith.constant 0 : index
      %c0_55 = arith.constant 0 : index
      %53 = vector.load %arg13[%c0_54, %c0_55] : memref<2x32xf32, #tpu.memory_space<vmem>>, vector<2x32xf32>
      %54 = arith.mulf %44, %53 : vector<2x32xf32>
      %55 = arith.mulf %38, %46 : vector<2x32xf32>
      %56 = arith.addf %54, %55 : vector<2x32xf32>
      %57 = math.tanh %56 : vector<2x32xf32>
      %58 = arith.mulf %52, %57 : vector<2x32xf32>
      %59 = vector.broadcast %arg14 : i32 to vector<2x1xi32>
      %60 = arith.cmpi sgt, %0, %59 : vector<2x1xi32>
      %c0_56 = arith.constant 0 : index
      %c0_57 = arith.constant 0 : index
      %61 = vector.load %arg12[%c0_56, %c0_57] : memref<2x32xf32, #tpu.memory_space<vmem>>, vector<2x32xf32>
      %62 = vector.shape_cast %60 : vector<2x1xi1> to vector<2x1xi1>
      %63 = vector.broadcast %62 : vector<2x1xi1> to vector<2x32xi1>
      %64 = arith.select %63, %58, %61 : vector<2x32xi1>, vector<2x32xf32>
      %c0_58 = arith.constant 0 : index
      %c0_59 = arith.constant 0 : index
      %65 = vector.load %arg12[%c0_58, %c0_59] : memref<2x32xf32, #tpu.memory_space<vmem>>, vector<2x32xf32>
      tpu.vector_store %arg12[%c0_58, %c0_59], %64 {strides = array<i32>} : memref<2x32xf32, #tpu.memory_space<vmem>>, vector<2x32xf32>,
      %c0_60 = arith.constant 0 : index
      %c0_61 = arith.constant 0 : index
      %66 = vector.load %arg13[%c0_60, %c0_61] : memref<2x32xf32, #tpu.memory_space<vmem>>, vector<2x32xf32>
      %67 = vector.shape_cast %60 : vector<2x1xi1> to vector<2x1xi1>
      %68 = vector.broadcast %67 : vector<2x1xi1> to vector<2x32xi1>
      %69 = arith.select %68, %56, %66 : vector<2x32xi1>, vector<2x32xf32>
      %c0_62 = arith.constant 0 : index
      %c0_63 = arith.constant 0 : index
      %70 = vector.load %arg13[%c0_62, %c0_63] : memref<2x32xf32, #tpu.memory_space<vmem>>, vector<2x32xf32>
      tpu.vector_store %arg13[%c0_62, %c0_63], %69 {strides = array<i32>} : memref<2x32xf32, #tpu.memory_space<vmem>>, vector<2x32xf32>,
      %cst_64 = arith.constant 0.000000e+00 : f32
      %71 = vector.shape_cast %60 : vector<2x1xi1> to vector<2x1xi1>
      %72 = vector.broadcast %71 : vector<2x1xi1> to vector<2x32xi1>
      %73 = vector.broadcast %cst_64 : f32 to vector<2x32xf32>
      %74 = arith.select %72, %58, %73 : vector<2x32xi1>, vector<2x32xf32>
      %75 = arith.index_cast %arg14 : i32 to index
      %c0_65 = arith.constant 0 : index
      %c0_66 = arith.constant 0 : index
      %76 = vector.load %arg8[%75, %c0_65, %c0_66] : memref<8x2x32xf32, #tpu.memory_space<vmem>>, vector<1x2x32xf32>
      %77 = vector.shape_cast %76 : vector<1x2x32xf32> to vector<2x32xf32>
      %78 = vector.shape_cast %74 : vector<2x32xf32> to vector<1x2x32xf32>
      tpu.vector_store %arg8[%75, %c0_65, %c0_66], %78 {strides = array<i32>} : memref<8x2x32xf32, #tpu.memory_space<vmem>>, vector<1x2x32xf32>,
    }
    %c8_i32_10 = arith.constant 8 : i32
    %cst_11 = arith.constant 0.000000e+00 : f32
    %8 = vector.broadcast %cst_11 : f32 to vector<2x32xf32>
    %c0_12 = arith.constant 0 : index
    %c0_13 = arith.constant 0 : index
    %9 = vector.load %arg12[%c0_12, %c0_13] : memref<2x32xf32, #tpu.memory_space<vmem>>, vector<2x32xf32>
    tpu.vector_store %arg12[%c0_12, %c0_13], %8 {strides = array<i32>} : memref<2x32xf32, #tpu.memory_space<vmem>>, vector<2x32xf32>,
    %cst_14 = arith.constant 0.000000e+00 : f32
    %10 = vector.broadcast %cst_14 : f32 to vector<2x32xf32>
    %c0_15 = arith.constant 0 : index
    %c0_16 = arith.constant 0 : index
    %11 = vector.load %arg13[%c0_15, %c0_16] : memref<2x32xf32, #tpu.memory_space<vmem>>, vector<2x32xf32>
    tpu.vector_store %arg13[%c0_15, %c0_16], %10 {strides = array<i32>} : memref<2x32xf32, #tpu.memory_space<vmem>>, vector<2x32xf32>,
    %c0_17 = arith.constant 0 : index
    %c0_18 = arith.constant 0 : index
    %12 = vector.load %arg5[%c0_17, %c0_18] : memref<32x128xf32, #tpu.memory_space<vmem>>, vector<32x128xf32>
    %c0_i32_19 = arith.constant 0 : i32
    %c8_i32_20 = arith.constant 8 : i32
    %13 = arith.addi %c0_i32_19, %c8_i32_20 : i32
    %c1_i32_21 = arith.constant 1 : i32
    scf.for %arg14 = %c0_i32_19 to %13 step %c1_i32_21  : i32 {
      %c7_i32 = arith.constant 7 : i32
      %26 = arith.subi %c7_i32, %arg14 : i32
      %27 = arith.index_cast %26 : i32 to index
      %c0_46 = arith.constant 0 : index
      %c0_47 = arith.constant 0 : index
      %28 = vector.load %arg0[%27, %c0_46, %c0_47] : memref<8x2x256xf32, #tpu.memory_space<vmem>>, vector<1x2x256xf32>
      %29 = vector.shape_cast %28 : vector<1x2x256xf32> to vector<2x256xf32>
      %30 = vector.extract_strided_slice %29 {offsets = [0, 128], sizes = [2, 128], strides = [1, 1]} : vector<2x256xf32> to vector<2x128xf32>
      %c0_48 = arith.constant 0 : index
      %c0_49 = arith.constant 0 : index
      %31 = vector.load %arg12[%c0_48, %c0_49] : memref<2x32xf32, #tpu.memory_space<vmem>>, vector<2x32xf32>
      %cst_50 = arith.constant dense<0.000000e+00> : vector<2x128xf32>
      %32 = tpu.matmul %31, %12, %cst_50 {dimension_numbers = #tpu.dot_dimension_numbers<[1], [0], [0], [1], [0, 0, 1, 1], [], []>} : vector<2x32xf32>, vector<32x128xf32>, vector<2x128xf32> -> vector<2x128xf32>
      %33 = arith.addf %30, %32 : vector<2x128xf32>
      %34 = vector.extract_strided_slice %33 {offsets = [0, 0], sizes = [2, 32], strides = [1, 1]} : vector<2x128xf32> to vector<2x32xf32>
      %35 = arith.negf %34 : vector<2x32xf32>
      %36 = math.exp %35 : vector<2x32xf32>
      %cst_51 = arith.constant 1.000000e+00 : f32
      %37 = vector.broadcast %cst_51 : f32 to vector<2x32xf32>
      %38 = arith.addf %37, %36 : vector<2x32xf32>
      %39 = arith.divf %37, %38 : vector<2x32xf32>
      %40 = vector.extract_strided_slice %33 {offsets = [0, 32], sizes = [2, 32], strides = [1, 1]} : vector<2x128xf32> to vector<2x32xf32>
      %41 = arith.negf %40 : vector<2x32xf32>
      %42 = math.exp %41 : vector<2x32xf32>
      %cst_52 = arith.constant 1.000000e+00 : f32
      %43 = vector.broadcast %cst_52 : f32 to vector<2x32xf32>
      %44 = arith.addf %43, %42 : vector<2x32xf32>
      %45 = arith.divf %43, %44 : vector<2x32xf32>
      %46 = vector.extract_strided_slice %33 {offsets = [0, 64], sizes = [2, 32], strides = [1, 1]} : vector<2x128xf32> to vector<2x32xf32>
      %47 = math.tanh %46 : vector<2x32xf32>
      %48 = vector.extract_strided_slice %33 {offsets = [0, 96], sizes = [2, 32], strides = [1, 1]} : vector<2x128xf32> to vector<2x32xf32>
      %49 = arith.negf %48 : vector<2x32xf32>
      %50 = math.exp %49 : vector<2x32xf32>
      %cst_53 = arith.constant 1.000000e+00 : f32
      %51 = vector.broadcast %cst_53 : f32 to vector<2x32xf32>
      %52 = arith.addf %51, %50 : vector<2x32xf32>
      %53 = arith.divf %51, %52 : vector<2x32xf32>
      %c0_54 = arith.constant 0 : index
      %c0_55 = arith.constant 0 : index
      %54 = vector.load %arg13[%c0_54, %c0_55] : memref<2x32xf32, #tpu.memory_space<vmem>>, vector<2x32xf32>
      %55 = arith.mulf %45, %54 : vector<2x32xf32>
      %56 = arith.mulf %39, %47 : vector<2x32xf32>
      %57 = arith.addf %55, %56 : vector<2x32xf32>
      %58 = math.tanh %57 : vector<2x32xf32>
      %59 = arith.mulf %53, %58 : vector<2x32xf32>
      %60 = vector.broadcast %26 : i32 to vector<2x1xi32>
      %61 = arith.cmpi sgt, %0, %60 : vector<2x1xi32>
      %c0_56 = arith.constant 0 : index
      %c0_57 = arith.constant 0 : index
      %62 = vector.load %arg12[%c0_56, %c0_57] : memref<2x32xf32, #tpu.memory_space<vmem>>, vector<2x32xf32>
      %63 = vector.shape_cast %61 : vector<2x1xi1> to vector<2x1xi1>
      %64 = vector.broadcast %63 : vector<2x1xi1> to vector<2x32xi1>
      %65 = arith.select %64, %59, %62 : vector<2x32xi1>, vector<2x32xf32>
      %c0_58 = arith.constant 0 : index
      %c0_59 = arith.constant 0 : index
      %66 = vector.load %arg12[%c0_58, %c0_59] : memref<2x32xf32, #tpu.memory_space<vmem>>, vector<2x32xf32>
      tpu.vector_store %arg12[%c0_58, %c0_59], %65 {strides = array<i32>} : memref<2x32xf32, #tpu.memory_space<vmem>>, vector<2x32xf32>,
      %c0_60 = arith.constant 0 : index
      %c0_61 = arith.constant 0 : index
      %67 = vector.load %arg13[%c0_60, %c0_61] : memref<2x32xf32, #tpu.memory_space<vmem>>, vector<2x32xf32>
      %68 = vector.shape_cast %61 : vector<2x1xi1> to vector<2x1xi1>
      %69 = vector.broadcast %68 : vector<2x1xi1> to vector<2x32xi1>
      %70 = arith.select %69, %57, %67 : vector<2x32xi1>, vector<2x32xf32>
      %c0_62 = arith.constant 0 : index
      %c0_63 = arith.constant 0 : index
      %71 = vector.load %arg13[%c0_62, %c0_63] : memref<2x32xf32, #tpu.memory_space<vmem>>, vector<2x32xf32>
      tpu.vector_store %arg13[%c0_62, %c0_63], %70 {strides = array<i32>} : memref<2x32xf32, #tpu.memory_space<vmem>>, vector<2x32xf32>,
      %cst_64 = arith.constant 0.000000e+00 : f32
      %72 = vector.shape_cast %61 : vector<2x1xi1> to vector<2x1xi1>
      %73 = vector.broadcast %72 : vector<2x1xi1> to vector<2x32xi1>
      %74 = vector.broadcast %cst_64 : f32 to vector<2x32xf32>
      %75 = arith.select %73, %59, %74 : vector<2x32xi1>, vector<2x32xf32>
      %76 = arith.index_cast %26 : i32 to index
      %c0_65 = arith.constant 0 : index
      %c0_66 = arith.constant 0 : index
      %77 = vector.load %arg9[%76, %c0_65, %c0_66] : memref<8x2x32xf32, #tpu.memory_space<vmem>>, vector<1x2x32xf32>
      %78 = vector.shape_cast %77 : vector<1x2x32xf32> to vector<2x32xf32>
      %79 = vector.shape_cast %75 : vector<2x32xf32> to vector<1x2x32xf32>
      tpu.vector_store %arg9[%76, %c0_65, %c0_66], %79 {strides = array<i32>} : memref<8x2x32xf32, #tpu.memory_space<vmem>>, vector<1x2x32xf32>,
    }
    %c8_i32_22 = arith.constant 8 : i32
    %cst_23 = arith.constant 0.000000e+00 : f32
    %14 = vector.broadcast %cst_23 : f32 to vector<2x32xf32>
    %c0_24 = arith.constant 0 : index
    %c0_25 = arith.constant 0 : index
    %15 = vector.load %arg12[%c0_24, %c0_25] : memref<2x32xf32, #tpu.memory_space<vmem>>, vector<2x32xf32>
    tpu.vector_store %arg12[%c0_24, %c0_25], %14 {strides = array<i32>} : memref<2x32xf32, #tpu.memory_space<vmem>>, vector<2x32xf32>,
    %cst_26 = arith.constant 0.000000e+00 : f32
    %16 = vector.broadcast %cst_26 : f32 to vector<2x32xf32>
    %c0_27 = arith.constant 0 : index
    %c0_28 = arith.constant 0 : index
    %17 = vector.load %arg13[%c0_27, %c0_28] : memref<2x32xf32, #tpu.memory_space<vmem>>, vector<2x32xf32>
    tpu.vector_store %arg13[%c0_27, %c0_28], %16 {strides = array<i32>} : memref<2x32xf32, #tpu.memory_space<vmem>>, vector<2x32xf32>,
    %c0_29 = arith.constant 0 : index
    %c0_30 = arith.constant 0 : index
    %18 = vector.load %arg6[%c0_29, %c0_30] : memref<32x128xf32, #tpu.memory_space<vmem>>, vector<32x128xf32>
    %c0_i32_31 = arith.constant 0 : i32
    %c4_i32 = arith.constant 4 : i32
    %19 = arith.addi %c0_i32_31, %c4_i32 : i32
    %c1_i32_32 = arith.constant 1 : i32
    scf.for %arg14 = %c0_i32_31 to %19 step %c1_i32_32  : i32 {
      %26 = arith.index_cast %arg14 : i32 to index
      %c0_46 = arith.constant 0 : index
      %c0_47 = arith.constant 0 : index
      %27 = vector.load %arg1[%26, %c0_46, %c0_47] : memref<4x2x256xf32, #tpu.memory_space<vmem>>, vector<1x2x256xf32>
      %28 = vector.shape_cast %27 : vector<1x2x256xf32> to vector<2x256xf32>
      %29 = vector.extract_strided_slice %28 {offsets = [0, 0], sizes = [2, 128], strides = [1, 1]} : vector<2x256xf32> to vector<2x128xf32>
      %c0_48 = arith.constant 0 : index
      %c0_49 = arith.constant 0 : index
      %30 = vector.load %arg12[%c0_48, %c0_49] : memref<2x32xf32, #tpu.memory_space<vmem>>, vector<2x32xf32>
      %cst_50 = arith.constant dense<0.000000e+00> : vector<2x128xf32>
      %31 = tpu.matmul %30, %18, %cst_50 {dimension_numbers = #tpu.dot_dimension_numbers<[1], [0], [0], [1], [0, 0, 1, 1], [], []>} : vector<2x32xf32>, vector<32x128xf32>, vector<2x128xf32> -> vector<2x128xf32>
      %32 = arith.addf %29, %31 : vector<2x128xf32>
      %33 = vector.extract_strided_slice %32 {offsets = [0, 0], sizes = [2, 32], strides = [1, 1]} : vector<2x128xf32> to vector<2x32xf32>
      %34 = arith.negf %33 : vector<2x32xf32>
      %35 = math.exp %34 : vector<2x32xf32>
      %cst_51 = arith.constant 1.000000e+00 : f32
      %36 = vector.broadcast %cst_51 : f32 to vector<2x32xf32>
      %37 = arith.addf %36, %35 : vector<2x32xf32>
      %38 = arith.divf %36, %37 : vector<2x32xf32>
      %39 = vector.extract_strided_slice %32 {offsets = [0, 32], sizes = [2, 32], strides = [1, 1]} : vector<2x128xf32> to vector<2x32xf32>
      %40 = arith.negf %39 : vector<2x32xf32>
      %41 = math.exp %40 : vector<2x32xf32>
      %cst_52 = arith.constant 1.000000e+00 : f32
      %42 = vector.broadcast %cst_52 : f32 to vector<2x32xf32>
      %43 = arith.addf %42, %41 : vector<2x32xf32>
      %44 = arith.divf %42, %43 : vector<2x32xf32>
      %45 = vector.extract_strided_slice %32 {offsets = [0, 64], sizes = [2, 32], strides = [1, 1]} : vector<2x128xf32> to vector<2x32xf32>
      %46 = math.tanh %45 : vector<2x32xf32>
      %47 = vector.extract_strided_slice %32 {offsets = [0, 96], sizes = [2, 32], strides = [1, 1]} : vector<2x128xf32> to vector<2x32xf32>
      %48 = arith.negf %47 : vector<2x32xf32>
      %49 = math.exp %48 : vector<2x32xf32>
      %cst_53 = arith.constant 1.000000e+00 : f32
      %50 = vector.broadcast %cst_53 : f32 to vector<2x32xf32>
      %51 = arith.addf %50, %49 : vector<2x32xf32>
      %52 = arith.divf %50, %51 : vector<2x32xf32>
      %c0_54 = arith.constant 0 : index
      %c0_55 = arith.constant 0 : index
      %53 = vector.load %arg13[%c0_54, %c0_55] : memref<2x32xf32, #tpu.memory_space<vmem>>, vector<2x32xf32>
      %54 = arith.mulf %44, %53 : vector<2x32xf32>
      %55 = arith.mulf %38, %46 : vector<2x32xf32>
      %56 = arith.addf %54, %55 : vector<2x32xf32>
      %57 = math.tanh %56 : vector<2x32xf32>
      %58 = arith.mulf %52, %57 : vector<2x32xf32>
      %59 = vector.broadcast %arg14 : i32 to vector<2x1xi32>
      %60 = arith.cmpi sgt, %1, %59 : vector<2x1xi32>
      %c0_56 = arith.constant 0 : index
      %c0_57 = arith.constant 0 : index
      %61 = vector.load %arg12[%c0_56, %c0_57] : memref<2x32xf32, #tpu.memory_space<vmem>>, vector<2x32xf32>
      %62 = vector.shape_cast %60 : vector<2x1xi1> to vector<2x1xi1>
      %63 = vector.broadcast %62 : vector<2x1xi1> to vector<2x32xi1>
      %64 = arith.select %63, %58, %61 : vector<2x32xi1>, vector<2x32xf32>
      %c0_58 = arith.constant 0 : index
      %c0_59 = arith.constant 0 : index
      %65 = vector.load %arg12[%c0_58, %c0_59] : memref<2x32xf32, #tpu.memory_space<vmem>>, vector<2x32xf32>
      tpu.vector_store %arg12[%c0_58, %c0_59], %64 {strides = array<i32>} : memref<2x32xf32, #tpu.memory_space<vmem>>, vector<2x32xf32>,
      %c0_60 = arith.constant 0 : index
      %c0_61 = arith.constant 0 : index
      %66 = vector.load %arg13[%c0_60, %c0_61] : memref<2x32xf32, #tpu.memory_space<vmem>>, vector<2x32xf32>
      %67 = vector.shape_cast %60 : vector<2x1xi1> to vector<2x1xi1>
      %68 = vector.broadcast %67 : vector<2x1xi1> to vector<2x32xi1>
      %69 = arith.select %68, %56, %66 : vector<2x32xi1>, vector<2x32xf32>
      %c0_62 = arith.constant 0 : index
      %c0_63 = arith.constant 0 : index
      %70 = vector.load %arg13[%c0_62, %c0_63] : memref<2x32xf32, #tpu.memory_space<vmem>>, vector<2x32xf32>
      tpu.vector_store %arg13[%c0_62, %c0_63], %69 {strides = array<i32>} : memref<2x32xf32, #tpu.memory_space<vmem>>, vector<2x32xf32>,
      %cst_64 = arith.constant 0.000000e+00 : f32
      %71 = vector.shape_cast %60 : vector<2x1xi1> to vector<2x1xi1>
      %72 = vector.broadcast %71 : vector<2x1xi1> to vector<2x32xi1>
      %73 = vector.broadcast %cst_64 : f32 to vector<2x32xf32>
      %74 = arith.select %72, %58, %73 : vector<2x32xi1>, vector<2x32xf32>
      %75 = arith.index_cast %arg14 : i32 to index
      %c0_65 = arith.constant 0 : index
      %c0_66 = arith.constant 0 : index
      %76 = vector.load %arg10[%75, %c0_65, %c0_66] : memref<4x2x32xf32, #tpu.memory_space<vmem>>, vector<1x2x32xf32>
      %77 = vector.shape_cast %76 : vector<1x2x32xf32> to vector<2x32xf32>
      %78 = vector.shape_cast %74 : vector<2x32xf32> to vector<1x2x32xf32>
      tpu.vector_store %arg10[%75, %c0_65, %c0_66], %78 {strides = array<i32>} : memref<4x2x32xf32, #tpu.memory_space<vmem>>, vector<1x2x32xf32>,
    }
    %c4_i32_33 = arith.constant 4 : i32
    %cst_34 = arith.constant 0.000000e+00 : f32
    %20 = vector.broadcast %cst_34 : f32 to vector<2x32xf32>
    %c0_35 = arith.constant 0 : index
    %c0_36 = arith.constant 0 : index
    %21 = vector.load %arg12[%c0_35, %c0_36] : memref<2x32xf32, #tpu.memory_space<vmem>>, vector<2x32xf32>
    tpu.vector_store %arg12[%c0_35, %c0_36], %20 {strides = array<i32>} : memref<2x32xf32, #tpu.memory_space<vmem>>, vector<2x32xf32>,
    %cst_37 = arith.constant 0.000000e+00 : f32
    %22 = vector.broadcast %cst_37 : f32 to vector<2x32xf32>
    %c0_38 = arith.constant 0 : index
    %c0_39 = arith.constant 0 : index
    %23 = vector.load %arg13[%c0_38, %c0_39] : memref<2x32xf32, #tpu.memory_space<vmem>>, vector<2x32xf32>
    tpu.vector_store %arg13[%c0_38, %c0_39], %22 {strides = array<i32>} : memref<2x32xf32, #tpu.memory_space<vmem>>, vector<2x32xf32>,
    %c0_40 = arith.constant 0 : index
    %c0_41 = arith.constant 0 : index
    %24 = vector.load %arg7[%c0_40, %c0_41] : memref<32x128xf32, #tpu.memory_space<vmem>>, vector<32x128xf32>
    %c0_i32_42 = arith.constant 0 : i32
    %c4_i32_43 = arith.constant 4 : i32
    %25 = arith.addi %c0_i32_42, %c4_i32_43 : i32
    %c1_i32_44 = arith.constant 1 : i32
    scf.for %arg14 = %c0_i32_42 to %25 step %c1_i32_44  : i32 {
      %c3_i32 = arith.constant 3 : i32
      %26 = arith.subi %c3_i32, %arg14 : i32
      %27 = arith.index_cast %26 : i32 to index
      %c0_46 = arith.constant 0 : index
      %c0_47 = arith.constant 0 : index
      %28 = vector.load %arg1[%27, %c0_46, %c0_47] : memref<4x2x256xf32, #tpu.memory_space<vmem>>, vector<1x2x256xf32>
      %29 = vector.shape_cast %28 : vector<1x2x256xf32> to vector<2x256xf32>
      %30 = vector.extract_strided_slice %29 {offsets = [0, 128], sizes = [2, 128], strides = [1, 1]} : vector<2x256xf32> to vector<2x128xf32>
      %c0_48 = arith.constant 0 : index
      %c0_49 = arith.constant 0 : index
      %31 = vector.load %arg12[%c0_48, %c0_49] : memref<2x32xf32, #tpu.memory_space<vmem>>, vector<2x32xf32>
      %cst_50 = arith.constant dense<0.000000e+00> : vector<2x128xf32>
      %32 = tpu.matmul %31, %24, %cst_50 {dimension_numbers = #tpu.dot_dimension_numbers<[1], [0], [0], [1], [0, 0, 1, 1], [], []>} : vector<2x32xf32>, vector<32x128xf32>, vector<2x128xf32> -> vector<2x128xf32>
      %33 = arith.addf %30, %32 : vector<2x128xf32>
      %34 = vector.extract_strided_slice %33 {offsets = [0, 0], sizes = [2, 32], strides = [1, 1]} : vector<2x128xf32> to vector<2x32xf32>
      %35 = arith.negf %34 : vector<2x32xf32>
      %36 = math.exp %35 : vector<2x32xf32>
      %cst_51 = arith.constant 1.000000e+00 : f32
      %37 = vector.broadcast %cst_51 : f32 to vector<2x32xf32>
      %38 = arith.addf %37, %36 : vector<2x32xf32>
      %39 = arith.divf %37, %38 : vector<2x32xf32>
      %40 = vector.extract_strided_slice %33 {offsets = [0, 32], sizes = [2, 32], strides = [1, 1]} : vector<2x128xf32> to vector<2x32xf32>
      %41 = arith.negf %40 : vector<2x32xf32>
      %42 = math.exp %41 : vector<2x32xf32>
      %cst_52 = arith.constant 1.000000e+00 : f32
      %43 = vector.broadcast %cst_52 : f32 to vector<2x32xf32>
      %44 = arith.addf %43, %42 : vector<2x32xf32>
      %45 = arith.divf %43, %44 : vector<2x32xf32>
      %46 = vector.extract_strided_slice %33 {offsets = [0, 64], sizes = [2, 32], strides = [1, 1]} : vector<2x128xf32> to vector<2x32xf32>
      %47 = math.tanh %46 : vector<2x32xf32>
      %48 = vector.extract_strided_slice %33 {offsets = [0, 96], sizes = [2, 32], strides = [1, 1]} : vector<2x128xf32> to vector<2x32xf32>
      %49 = arith.negf %48 : vector<2x32xf32>
      %50 = math.exp %49 : vector<2x32xf32>
      %cst_53 = arith.constant 1.000000e+00 : f32
      %51 = vector.broadcast %cst_53 : f32 to vector<2x32xf32>
      %52 = arith.addf %51, %50 : vector<2x32xf32>
      %53 = arith.divf %51, %52 : vector<2x32xf32>
      %c0_54 = arith.constant 0 : index
      %c0_55 = arith.constant 0 : index
      %54 = vector.load %arg13[%c0_54, %c0_55] : memref<2x32xf32, #tpu.memory_space<vmem>>, vector<2x32xf32>
      %55 = arith.mulf %45, %54 : vector<2x32xf32>
      %56 = arith.mulf %39, %47 : vector<2x32xf32>
      %57 = arith.addf %55, %56 : vector<2x32xf32>
      %58 = math.tanh %57 : vector<2x32xf32>
      %59 = arith.mulf %53, %58 : vector<2x32xf32>
      %60 = vector.broadcast %26 : i32 to vector<2x1xi32>
      %61 = arith.cmpi sgt, %1, %60 : vector<2x1xi32>
      %c0_56 = arith.constant 0 : index
      %c0_57 = arith.constant 0 : index
      %62 = vector.load %arg12[%c0_56, %c0_57] : memref<2x32xf32, #tpu.memory_space<vmem>>, vector<2x32xf32>
      %63 = vector.shape_cast %61 : vector<2x1xi1> to vector<2x1xi1>
      %64 = vector.broadcast %63 : vector<2x1xi1> to vector<2x32xi1>
      %65 = arith.select %64, %59, %62 : vector<2x32xi1>, vector<2x32xf32>
      %c0_58 = arith.constant 0 : index
      %c0_59 = arith.constant 0 : index
      %66 = vector.load %arg12[%c0_58, %c0_59] : memref<2x32xf32, #tpu.memory_space<vmem>>, vector<2x32xf32>
      tpu.vector_store %arg12[%c0_58, %c0_59], %65 {strides = array<i32>} : memref<2x32xf32, #tpu.memory_space<vmem>>, vector<2x32xf32>,
      %c0_60 = arith.constant 0 : index
      %c0_61 = arith.constant 0 : index
      %67 = vector.load %arg13[%c0_60, %c0_61] : memref<2x32xf32, #tpu.memory_space<vmem>>, vector<2x32xf32>
      %68 = vector.shape_cast %61 : vector<2x1xi1> to vector<2x1xi1>
      %69 = vector.broadcast %68 : vector<2x1xi1> to vector<2x32xi1>
      %70 = arith.select %69, %57, %67 : vector<2x32xi1>, vector<2x32xf32>
      %c0_62 = arith.constant 0 : index
      %c0_63 = arith.constant 0 : index
      %71 = vector.load %arg13[%c0_62, %c0_63] : memref<2x32xf32, #tpu.memory_space<vmem>>, vector<2x32xf32>
      tpu.vector_store %arg13[%c0_62, %c0_63], %70 {strides = array<i32>} : memref<2x32xf32, #tpu.memory_space<vmem>>, vector<2x32xf32>,
      %cst_64 = arith.constant 0.000000e+00 : f32
      %72 = vector.shape_cast %61 : vector<2x1xi1> to vector<2x1xi1>
      %73 = vector.broadcast %72 : vector<2x1xi1> to vector<2x32xi1>
      %74 = vector.broadcast %cst_64 : f32 to vector<2x32xf32>
      %75 = arith.select %73, %59, %74 : vector<2x32xi1>, vector<2x32xf32>
      %76 = arith.index_cast %26 : i32 to index
      %c0_65 = arith.constant 0 : index
      %c0_66 = arith.constant 0 : index
      %77 = vector.load %arg11[%76, %c0_65, %c0_66] : memref<4x2x32xf32, #tpu.memory_space<vmem>>, vector<1x2x32xf32>
      %78 = vector.shape_cast %77 : vector<1x2x32xf32> to vector<2x32xf32>
      %79 = vector.shape_cast %75 : vector<2x32xf32> to vector<1x2x32xf32>
      tpu.vector_store %arg11[%76, %c0_65, %c0_66], %79 {strides = array<i32>} : memref<4x2x32xf32, #tpu.memory_space<vmem>>, vector<1x2x32xf32>,
    }
    %c4_i32_45 = arith.constant 4 : i32
    return
  }
}

</mosaic_0001>

<bundles_post_ra>
// kernel: tnet_lf_unit_forward.3
= control target key start
LH: loop header
LB: loop body
LE: loop exit
PB: predicated region body
PF: predicated region fallthrough
CT: control target
= control target key end

     0   :  { %13 = vsyncpa [#allocation3], 0  ;;  %s1911_s0 = inlined_call_operand.vmem [shape: f32[2,8,64], index: 0, kind: input, shape index: {}]   ;;  %s1912_s1 = inlined_call_operand.vmem [shape: f32[2,4,64], index: 1, kind: input, shape index: {}]   ;;  %s1913_s2 = inlined_call_operand.vmem [shape: f32[2,8,1], index: 2, kind: input, shape index: {}]   ;;  %s1914_s3 = inlined_call_operand.vmem [shape: f32[64,64], index: 3, kind: input, shape index: {}]   ;;  %s1915_s4 = inlined_call_operand.vmem [shape: f32[64,64], index: 4, kind: input, shape index: {}]   ;;  %s1916_s5 = inlined_call_operand.vmem [shape: f32[1,64], index: 5, kind: input, shape index: {}]   ;;  %s1917_s6 = inlined_call_operand.vmem [shape: f32[192,50], index: 6, kind: input, shape index: {}]   ;;  %s1918_s7 = inlined_call_operand.vmem [shape: f32[1,50], index: 7, kind: input, shape index: {}]   ;;  %s1919_s8 = inlined_call_operand.hbm [shape: f32[2,1,50], index: 8, kind: output, shape index: {}]  }
   0x1   :  { %15 = vsyncpa [#allocation3 + $0x1], 0  ;;  %s1531_s27 = smov 0   ;;  %s1533_s28 = smov 0  }
   0x2   :  { %s1535_s29 = smov 0   ;;  %s1537_s30 = smov 0  }
   0x3 LB: > { %s1552_s9 = sadd.s32 4294967295, %s1479_s30   ;;  %s1201_s10 = sadd.s32 4294967294, %s1479_s30   ;;  %s1479_s30 = sphi %s1537_s30, %s1925_s30   ;;  %s1475_s29 = sphi %s1535_s29, %s1924_s29   ;;  %s1471_s28 = sphi %s1533_s28, %s1923_s28   ;;  %s1467_s27 = sphi %s1531_s27, %s1922_s27  }
   0x4   : > { %s1556_s11 = sadd.s32 1, %s1479_s30   ;;  %s211_s12 = sadd.s32 1, %s1475_s29 }
   0x5   : > { %s208_s13 = ssub.s32 %s1479_s30, %s1556_s11  ;;  %p221_p0 = scmp.ne.s32.totalorder %s1475_s29, %s1471_s28 }
   0x6   : > { %p209_p1 = scmp.eq.s32.totalorder %s208_s13, 0  ;;  %p222_p2 = scmp.eq.s32.totalorder %s1552_s9, 1 }
   0x7   : > { %p227_p3 = scmp.ne.s32.totalorder %s1471_s28, %s1467_s27  ;;  %p228_p4 = scmp.eq.s32.totalorder %s1201_s10, 1 }
   0x8   : > { %s1567_s14 = scalar_select %p209_p1, %s1475_s29, %s211_s12  }
   0x9   : > { %p1569_p5 = por %p222_p2, %p221_p0  ;;  %p1573_p6 = por %p228_p4, %p227_p3 }
   0xa   : > { %p1204_p7 = scmp.ge.s32.totalorder %s1479_s30, 1  ;;  %p282_p8 = scmp.lt.s32.totalorder %s1479_s30, 3 }
   0xc   : > { %p283_p9 = pnand %p1204_p7, %p282_p8 }
   0xd   : > { %p322_p10 = scmp.lt.s32.totalorder (!%p283_p9), %s1552_s9, 1  ;;  %s1484_s26 = smov (!%p283_p9), 64  }
   0xe   : > { %286 = sbr.rel (%p283_p9) target bundleno = 2168 (0x878), region = 52  ;;  %s1223_s12 = sshll.u32 (!%p283_p9), %s1552_s9, 4 }
  0x13   : > { %v1481_v0 = vmov 0.0   ;;  %vm1482_vm0 = vmmov 0   ;;  %s1584_s17 = scalar_select %p322_p10, %s1552_s9, 1  ;;  %vm354_vm1 = vcmask 523264   ;;  %vm431_vm2 = vcmask 31744   ;;  %v352_v11 = vld [vmem:[%s1915_s4 + $0x38] sm:$0xff] }
  0x14   : > { %1270 = vmatprep.subr.mxu0 %v1481_v0  ;;  %1272 = vmatprep.mubr.msk.f32.mxu0 %vm1482_vm0, %v1481_v0  ;;  %vm446_vm3 = vcmask 1043456   ;;  %v351_v12 = vld [vmem:[%s1915_s4 + $0x30] sm:$0xff]  ;;  %v350_v13 = vld [vmem:[%s1915_s4 + $0x28] sm:$0xff]  ;;  %v349_v14 = vld [vmem:[%s1915_s4 + $0x20] sm:$0xff]  ;;  %v1483_v30 = vmov 0   ;;  %vm988_vm4 = vcmask 1046528  }
  0x15   : > { %1328 = vmatprep.subr.mxu1 %v1481_v0  ;;  %1344 = vmatprep.mubr.msk.f32.mxu1 %vm1482_vm0, %v1481_v0  ;;  %s1206_s18 = sshll.u32 %s1584_s17, 2  ;;  %s1205_s19 = sshll.u32 %s1584_s17, 3  ;;  %v348_v15 = vld [vmem:[%s1915_s4 + $0x18] sm:$0xff]  ;;  %v347_v16 = vld [vmem:[%s1915_s4 + $0x10] sm:$0xff]  ;;  %v346_v17 = vld [vmem:[%s1915_s4 + $0x8] sm:$0xff]  ;;  %vm984_vm5 = vcmask 1040384  }
  0x16   : > { %s329_s22 = scalar_lea.vmem %s1912_s1, %s1206_s18  ;;  %s325_s25 = scalar_lea.vmem %s1911_s0, %s1205_s19  ;;  %1329 = vmatpush3.msra.mxu1 %v352_v11  ;;  %v345_v18 = vld [vmem:[%s1915_s4] sm:$0xff]  ;;  %v1660_v22 = vld [vmem:[%s1914_s3 + $0x38] sm:$0xff]  ;;  %v1668_v23 = vld [vmem:[%s1914_s3 + $0x30] sm:$0xff]  ;;  %1409 = vset.pattern.permute.xlu1 %v1483_v30  ;;  %vm1099_vm6 = vcmask 408576   ;;  %vm1107_vm7 = vcmask 401408  }
  0x17   : > { %v1599_v1 = vld [vmem:[%s329_s22] sm:$0xf]  ;;  %1330 = vmatprep.subr.mxu1 %v1481_v0  ;;  %v1677_v24 = vld [vmem:[%s1914_s3 + $0x28] sm:$0xff]  ;;  %v1691_v26 = vld [vmem:[%s1914_s3 + $0x18] sm:$0xff]  ;;  %s333_s10 = scalar_lea.vmem %s1913_s2, %s1205_s19  ;;  %1410 = vset.pattern.permute.xlu0 %v1483_v30  ;;  %s320_s19 = sand.u32 1, %s1471_s28  }
  0x18   : > { %1271 = vmatpush3.xpose.msk.msra.mxu0 %vm354_vm1, %v1599_v1  ;;  %v1603_v2 = vld [vmem:[%s325_s25] sm:$0xff]  ;;  %1331 = vmatpush3.msra.mxu1 %v351_v12  ;;  %v1698_v27 = vld [vmem:[%s1914_s3 + $0x10] sm:$0xff]  ;;  %v1705_v28 = vld [vmem:[%s1914_s3 + $0x8] sm:$0xff]  ;;  %s321_s13 = scalar_lea.vmem [#allocation2], %s320_s19  ;;  %s1120_s22 = scalar_lea.hbm %s1919_s8, %s1223_s12 }
  0x19   : > { %1275 = vmatprep.subr.mxu0 %v1481_v0  ;;  %1332 = vmatprep.subr.mxu1 %v1481_v0  ;;  %v1684_v25 = vld [vmem:[%s1914_s3 + $0x20] sm:$0xff]  ;;  %v1009_v60 = vld [vmem:[%s1917_s6 + $0x78] sm:$0xff]  ;;  %v1008_v61 = vld [vmem:[%s1917_s6 + $0x70] sm:$0xff]  ;;  %s1122_s18 = sshll.u32 %s321_s13, 4  ;;  %s1110_s23 = scalar_lea.sflag [#allocation3], %s320_s19  ;;  %s1123_s18 = int_to_ptr.vmem [resolvable:$true] %s1122_s18 }
  0x1a   : > { %1333 = vmatpush3.msra.mxu1 %v350_v13  ;;  %v1714_v29 = vld [vmem:[%s1914_s3] sm:$0xff]  ;;  %v1007_v62 = vld [vmem:[%s1917_s6 + $0x68] sm:$0xff]  ;;  %s1419_s24 = scalar_lea.vmem %s1123_s18, 16  ;;  %s1485_s25 = smov [#allocation2]  }
  0x1b   : > { %1273 = vmatmul.mubr.msk.f32.vlgmr.msra.gmra.mxu0 %vm354_vm1, %v1603_v2  ;;  %1334 = vmatprep.subr.mxu1 %v1481_v0  ;;  %v336_v31 = vld [vmem:[%s333_s10] sm:$0xff]  ;;  %p1420_p11 = scmp.ne.s32.totalorder %s1123_s18, %s1419_s24 }
  0x1c   : > { %1277 = vmatprep.mubr.msk.f32.mxu0 %vm1482_vm0, %v1481_v0  ;;  %1276 = vmatpush3.msk.msra.mxu0 %vm446_vm3, %v1599_v1  ;;  %v1732_v36 = vld [vmem:[%s1916_s5] ss:$0 sm:$0xff] }
  0x1d   : > { %1280 = vmatprep.subr.mxu0 %v1481_v0  ;;  %1335 = vmatpush3.msra.mxu1 %v349_v14  ;;  %v1006_v63 = vld [vmem:[%s1917_s6 + $0x60] sm:$0xff]  ;;  %p1421_p12 = pnand %p1420_p11, %p1569_p5 }
  0x1e   : > { %1336 = vmatprep.subr.mxu1 %v1481_v0  ;;  %673 = vperm.xlu1 %1409, %v336_v31  }
  0x1f   : > { %1337 = vmatpush3.msra.mxu1 %v348_v15  ;;  %p1422_p13 = pneg %p1421_p12 }
  0x20   : > { %1338 = vmatprep.subr.mxu1 %v1481_v0 }
  0x21   : > { %1339 = vmatpush3.msra.mxu1 %v347_v16 }
  0x22   : > { %1340 = vmatprep.subr.mxu1 %v1481_v0 }
  0x23   : > { %1341 = vmatpush3.msra.mxu1 %v346_v17 }
  0x24   : > { %1342 = vmatprep.subr.mxu1 %v1481_v0 }
  0x25   : > { %1343 = vmatpush3.msra.mxu1 %v345_v18 }
  0x26   : > { %1028 = vmatprep.subr.mxu1 %v1481_v0 }
  0x99   : > { %v1735_v42 = vpop.permute.xlu1 %673 }
  0xdb   : > { %v427_v3 = vpop.f32.mrf.mxu0 }
  0xdc   : > { %v432_v4 = vsel %vm431_vm2, %v427_v3, -inf }
  0xdd   : > { %433 = vmax.xlane.f32.xlu0 %v432_v4  ;;  %v1274_v5 = vpop.f32.mrf.mxu0  ;;  %v1002_v4 = vld [vmem:[%s1917_s6 + $0x40] sm:$0xff] }
  0xde   : > { %v1001_v5 = vld [vmem:[%s1917_s6 + $0x38] sm:$0xff] }
 0x166   : > { %v434_v6 = vpop.xlane.xlu0 %433 }
 0x167   : > { %v435_v7 = vsub.f32 %v427_v3, %v434_v6  ;;  %v1003_v3 = vld [vmem:[%s1917_s6 + $0x48] sm:$0xff]  ;;  %v1000_v6 = vld [vmem:[%s1917_s6 + $0x30] sm:$0xff] }
 0x169   : > { %v436_v8 = vmul.f32 1.442695, %v435_v7  ;;  %v999_v7 = vld [vmem:[%s1917_s6 + $0x28] sm:$0xff] }
 0x16b   : > { %1411 = vpow2.f32 %v436_v8  ;;  %v998_v8 = vld [vmem:[%s1917_s6 + $0x20] sm:$0xff] }
 0x178   : > { %v1412_v9 = vpop.eup %1411 }
 0x179   : > { %v438_v10 = vsel %vm431_vm2, %v1412_v9, 0.0 }
 0x17a   : > { %439 = vadd.xlane.f32.xlu0 %v438_v10  ;;  %v996_v10 = vld [vmem:[%s1917_s6 + $0x10] sm:$0xff] }
 0x203   : > { %v440_v19 = vpop.xlane.xlu0 %439 }
 0x204   : > { %1413 = vrcp.f32 %v440_v19  ;;  %v1011_v19 = vld [vmem:[%s1917_s6 + $0x88] sm:$0xff] }
 0x211   : > { %v1414_v20 = vpop.eup %1413 }
 0x212   : > { %v442_v21 = vmul.f32 %v1414_v20, %v1412_v9  ;;  %v997_v9 = vld [vmem:[%s1917_s6 + $0x18] sm:$0xff]  ;;  %v1010_v20 = vld [vmem:[%s1917_s6 + $0x80] sm:$0xff] }
 0x214   : > { %1278 = vmatmul.mubr.msk.f32.vlgmr.msra.gmra.mxu0 %vm431_vm2, %v442_v21 }
 0x215   : > { %1281 = vmatpush3.msra.mxu0 %v352_v11  ;;  %1296 = vmatprep.mubr.msk.f32.mxu0 %vm1482_vm0, %v1481_v0  ;;  %v995_v11 = vld [vmem:[%s1917_s6 + $0x8] sm:$0xff] }
 0x216   : > { %1282 = vmatprep.subr.mxu0 %v1481_v0 }
 0x217   : > { %1283 = vmatpush3.msra.mxu0 %v351_v12  ;;  %v994_v12 = vld [vmem:[%s1917_s6] sm:$0xff] }
 0x218   : > { %1284 = vmatprep.subr.mxu0 %v1481_v0 }
 0x219   : > { %1285 = vmatpush3.msra.mxu0 %v350_v13  ;;  %v1017_v13 = vld [vmem:[%s1917_s6 + $0xb8] sm:$0xff] }
 0x21a   : > { %1286 = vmatprep.subr.mxu0 %v1481_v0 }
 0x21b   : > { %1287 = vmatpush3.msra.mxu0 %v349_v14  ;;  %v1016_v14 = vld [vmem:[%s1917_s6 + $0xb0] sm:$0xff] }
 0x21c   : > { %1288 = vmatprep.subr.mxu0 %v1481_v0 }
 0x21d   : > { %1289 = vmatpush3.msra.mxu0 %v348_v15  ;;  %v1015_v15 = vld [vmem:[%s1917_s6 + $0xa8] sm:$0xff] }
 0x21e   : > { %1290 = vmatprep.subr.mxu0 %v1481_v0 }
 0x21f   : > { %1291 = vmatpush3.msra.mxu0 %v347_v16  ;;  %v1014_v16 = vld [vmem:[%s1917_s6 + $0xa0] sm:$0xff] }
 0x220   : > { %1292 = vmatprep.subr.mxu0 %v1481_v0 }
 0x221   : > { %1293 = vmatpush3.msra.mxu0 %v346_v17  ;;  %v1013_v17 = vld [vmem:[%s1917_s6 + $0x98] sm:$0xff] }
 0x222   : > { %1294 = vmatprep.subr.mxu0 %v1481_v0 }
 0x223   : > { %1295 = vmatpush3.msra.mxu0 %v345_v18  ;;  %v1012_v18 = vld [vmem:[%s1917_s6 + $0x90] sm:$0xff] }
 0x224   : > { %1297 = vmatmul.mubr.msk.f32.vlgmr.msra.gmra.mxu0 %vm354_vm1, %v1603_v2  ;;  %1299 = vmatprep.subr.mxu0 %v1481_v0 }
 0x225   : > { %1300 = vmatpush3.msra.mxu0 %v1660_v22  ;;  %1315 = vmatprep.mubr.msk.f32.mxu0 %vm1482_vm0, %v1481_v0 }
 0x226   : > { %1301 = vmatprep.subr.mxu0 %v1481_v0 }
 0x227   : > { %1302 = vmatpush3.msra.mxu0 %v1668_v23 }
 0x228   : > { %1303 = vmatprep.subr.mxu0 %v1481_v0 }
 0x229   : > { %1304 = vmatpush3.msra.mxu0 %v1677_v24 }
 0x22a   : > { %1305 = vmatprep.subr.mxu0 %v1481_v0 }
 0x22b   : > { %1306 = vmatpush3.msra.mxu0 %v1684_v25 }
 0x22c   : > { %1307 = vmatprep.subr.mxu0 %v1481_v0 }
 0x22d   : > { %1308 = vmatpush3.msra.mxu0 %v1691_v26 }
 0x22e   : > { %1309 = vmatprep.subr.mxu0 %v1481_v0 }
 0x22f   : > { %1310 = vmatpush3.msra.mxu0 %v1698_v27 }
 0x230   : > { %1311 = vmatprep.subr.mxu0 %v1481_v0 }
 0x231   : > { %1312 = vmatpush3.msra.mxu0 %v1705_v28 }
 0x232   : > { %1313 = vmatprep.subr.mxu0 %v1481_v0 }
 0x233   : > { %1314 = vmatpush3.msra.mxu0 %v1714_v29 }
 0x234   : > { %1318 = vmatprep.subr.mxu0 %v1481_v0 }
 0x2d4   : > { %v515_v32 = vpop.f32.mrf.mxu0 }
 0x2d5   : > { %1316 = vmatmul.mubr.msk.f32.vlgmr.msra.gmra.mxu0 %vm354_vm1, %v515_v32 }
 0x2d6   : > { %v1279_v33 = vpop.f32.mrf.mxu0  ;;  %1319 = vmatpush3.xpose.msk.msra.mxu0 %vm354_vm1, %v1599_v1  ;;  %1320 = vmatprep.mubr.msk.f32.mxu0 %vm1482_vm0, %v1481_v0 }
 0x2d7   : > { %1323 = vmatprep.subr.mxu0 %v1481_v0  ;;  %v1221_v33 = vld [vmem:[%s1918_s7] ss:$0 sm:$0xff] }
 0x2e4   : > { %v585_v34 = vpop.f32.mrf.mxu0 }
 0x2e6   : > { %v1298_v35 = vpop.f32.mrf.mxu0 }
 0x395   : > { %v658_v37 = vpop.f32.mrf.mxu0 }
 0x396   : > { %v659_v38 = vadd.f32 %v658_v37, %v585_v34 }
 0x397   : > { %v1317_v39 = vpop.f32.mrf.mxu0 }
 0x398   : > { %v668_v40 = vadd.f32 %v1732_v36, %v659_v38 }
 0x39a   : > { %v669_v41 = vmax.f32 %v668_v40, 0.0 }
 0x39c   : > { %v670_v43 = vadd.f32 %v669_v41, %v1603_v2  ;;  %v1004_v2 = vld [vmem:[%s1917_s6 + $0x50] sm:$0xff] }
 0x39e   : > { %v1739_v44 = vmul.f32 %v1735_v42, %v670_v43 }
 0x3a0   : > { %1321 = vmatmul.mubr.msk.f32.vlgmr.msra.gmra.mxu0 %vm354_vm1, %v1739_v44  ;;  %1345 = vmatmul.mubr.msk.f32.vlgmr.msra.gmra.mxu1 %vm354_vm1, %v1739_v44 }
 0x3a1   : > { %1324 = vmatpush3.msk.msra.mxu0 %vm446_vm3, %v1599_v1  ;;  %1325 = vmatprep.mubr.msk.f32.mxu0 %vm1482_vm0, %v1481_v0  ;;  %v1005_v1 = vld [vmem:[%s1917_s6 + $0x58] sm:$0xff] }
 0x3a2   : > { %1347 = vmatprep.subr.mxu0 %v1481_v0  ;;  %1029 = vmatpush1.msra.mxu1 %v1009_v60 }
 0x3a3   : > { %1030 = vmatprep.subr.mxu1 %v1481_v0 }
 0x3a4   : > { %1031 = vmatpush1.msra.mxu1 %v1008_v61 }
 0x3a5   : > { %1032 = vmatprep.subr.mxu1 %v1481_v0 }
 0x3a6   : > { %1033 = vmatpush1.msra.mxu1 %v1007_v62 }
 0x3a7   : > { %1034 = vmatprep.subr.mxu1 %v1481_v0 }
 0x3a8   : > { %1035 = vmatpush1.msra.mxu1 %v1006_v63 }
 0x3a9   : > { %1036 = vmatprep.subr.mxu1 %v1481_v0 }
 0x3aa   : > { %1037 = vmatpush1.msra.mxu1 %v1005_v1 }
 0x3ab   : > { %1038 = vmatprep.subr.mxu1 %v1481_v0 }
 0x3ac   : > { %1039 = vmatpush1.msra.mxu1 %v1004_v2 }
 0x3ad   : > { %1040 = vmatprep.subr.mxu1 %v1481_v0 }
 0x3ae   : > { %1041 = vmatpush1.msra.mxu1 %v1003_v3 }
 0x3af   : > { %1042 = vmatprep.subr.mxu1 %v1481_v0 }
 0x3b0   : > { %1043 = vmatpush1.msra.mxu1 %v1002_v4 }
 0x3b1   : > { %1044 = vmatprep.subr.mxu1 %v1481_v0 }
 0x3b2   : > { %1045 = vmatpush1.msra.mxu1 %v1001_v5 }
 0x3b3   : > { %1046 = vmatprep.subr.mxu1 %v1481_v0 }
 0x3b4   : > { %1047 = vmatpush1.msra.mxu1 %v1000_v6 }
 0x3b5   : > { %1048 = vmatprep.subr.mxu1 %v1481_v0 }
 0x3b6   : > { %1049 = vmatpush1.msra.mxu1 %v999_v7 }
 0x3b7   : > { %1050 = vmatprep.subr.mxu1 %v1481_v0 }
 0x3b8   : > { %1051 = vmatpush1.msra.mxu1 %v998_v8 }
 0x3b9   : > { %1052 = vmatprep.subr.mxu1 %v1481_v0 }
 0x3ba   : > { %1053 = vmatpush1.msra.mxu1 %v997_v9 }
 0x3bb   : > { %1054 = vmatprep.subr.mxu1 %v1481_v0 }
 0x3bc   : > { %1055 = vmatpush1.msra.mxu1 %v996_v10 }
 0x3bd   : > { %1056 = vmatprep.subr.mxu1 %v1481_v0 }
 0x3be   : > { %1057 = vmatpush1.msra.mxu1 %v995_v11 }
 0x3bf   : > { %1058 = vmatprep.subr.mxu1 %v1481_v0 }
 0x3c0   : > { %1059 = vmatpush1.msra.mxu1 %v994_v12 }
 0x3c1   : > { %1076 = vmatprep.subr.mxu1 %v1481_v0 }
 0x3c2   : > { %1077 = vmatpush2.msra.mxu1 %v1017_v13 }
 0x3c3   : > { %1078 = vmatprep.subr.mxu1 %v1481_v0 }
 0x3c4   : > { %1079 = vmatpush2.msra.mxu1 %v1016_v14 }
 0x3c5   : > { %1080 = vmatprep.subr.mxu1 %v1481_v0 }
 0x3c6   : > { %1081 = vmatpush2.msra.mxu1 %v1015_v15 }
 0x3c7   : > { %1082 = vmatprep.subr.mxu1 %v1481_v0 }
 0x3c8   : > { %1083 = vmatpush2.msra.mxu1 %v1014_v16 }
 0x3c9   : > { %1084 = vmatprep.subr.mxu1 %v1481_v0 }
 0x3ca   : > { %1085 = vmatpush2.msra.mxu1 %v1013_v17 }
 0x3cb   : > { %1086 = vmatprep.subr.mxu1 %v1481_v0 }
 0x3cc   : > { %1087 = vmatpush2.msra.mxu1 %v1012_v18 }
 0x3cd   : > { %1088 = vmatprep.subr.mxu1 %v1481_v0 }
 0x3ce   : > { %1089 = vmatpush2.msra.mxu1 %v1011_v19 }
 0x3cf   : > { %1090 = vmatprep.subr.mxu1 %v1481_v0 }
 0x3d0   : > { %1091 = vmatpush2.msra.mxu1 %v1010_v20 }
 0x460   : > { %v746_v45 = vpop.f32.mrf.mxu0  ;;  %v1750_v46 = vpop.f32.mrf.mxu1 }
 0x461   : > { %v750_v47 = vsel %vm431_vm2, %v746_v45, -inf }
 0x462   : > { %v1346_v48 = vpop.f32.mrf.mxu1  ;;  %751 = vmax.xlane.f32.xlu1 %v750_v47  ;;  %v1322_v49 = vpop.f32.mrf.mxu0 }
 0x4eb   : > { %v752_v50 = vpop.xlane.xlu1 %751 }
 0x4ec   : > { %v753_v51 = vsub.f32 %v746_v45, %v752_v50 }
 0x4ee   : > { %v754_v52 = vmul.f32 1.442695, %v753_v51 }
 0x4f0   : > { %1415 = vpow2.f32 %v754_v52 }
 0x4fd   : > { %v1416_v53 = vpop.eup %1415 }
 0x4fe   : > { %v756_v54 = vsel %vm431_vm2, %v1416_v53, 0.0 }
 0x4ff   : > { %757 = vadd.xlane.f32.xlu0 %v756_v54 }
 0x588   : > { %v758_v55 = vpop.xlane.xlu0 %757 }
 0x589   : > { %1417 = vrcp.f32 %v758_v55 }
 0x596   : > { %v1418_v56 = vpop.eup %1417 }
 0x597   : > { %v760_v57 = vmul.f32 %v1418_v56, %v1416_v53 }
 0x599   : > { %1326 = vmatmul.mubr.msk.f32.vlgmr.msra.gmra.mxu0 %vm431_vm2, %v760_v57 }
 0x59a   : > { %1348 = vmatpush3.msra.mxu0 %v1660_v22  ;;  %1363 = vmatprep.mubr.msk.f32.mxu0 %vm1482_vm0, %v1481_v0 }
 0x59b   : > { %1349 = vmatprep.subr.mxu0 %v1481_v0 }
 0x59c   : > { %1350 = vmatpush3.msra.mxu0 %v1668_v23 }
 0x59d   : > { %1351 = vmatprep.subr.mxu0 %v1481_v0 }
 0x59e   : > { %1352 = vmatpush3.msra.mxu0 %v1677_v24 }
 0x59f   : > { %1353 = vmatprep.subr.mxu0 %v1481_v0 }
 0x5a0   : > { %1354 = vmatpush3.msra.mxu0 %v1684_v25 }
 0x5a1   : > { %1355 = vmatprep.subr.mxu0 %v1481_v0 }
 0x5a2   : > { %1356 = vmatpush3.msra.mxu0 %v1691_v26 }
 0x5a3   : > { %1357 = vmatprep.subr.mxu0 %v1481_v0 }
 0x5a4   : > { %1358 = vmatpush3.msra.mxu0 %v1698_v27 }
 0x5a5   : > { %1359 = vmatprep.subr.mxu0 %v1481_v0 }
 0x5a6   : > { %1360 = vmatpush3.msra.mxu0 %v1705_v28 }
 0x5a7   : > { %1361 = vmatprep.subr.mxu0 %v1481_v0 }
 0x5a8   : > { %1362 = vmatpush3.msra.mxu0 %v1714_v29 }
 0x659   : > { %v830_v58 = vpop.f32.mrf.mxu0 }
 0x65a   : > { %1364 = vmatmul.mubr.msk.f32.vlgmr.msra.gmra.mxu0 %vm354_vm1, %v830_v58 }
 0x65b   : > { %v1327_v59 = vpop.f32.mrf.mxu0 }
 0x71a   : > { %v973_v21 = vpop.f32.mrf.mxu0 }
 0x71b   : > { %v974_v22 = vadd.f32 %v973_v21, %v1750_v46 }
 0x71c   : > { %v1365_v23 = vpop.f32.mrf.mxu0 }
 0x71d   : > { %v977_v24 = vadd.f32 %v1732_v36, %v974_v22 }
 0x71f   : > { %v978_v25 = vmax.f32 %v977_v24, 0.0 }
 0x721   : > { %v979_v26 = vadd.f32 %v978_v25, %v1739_v44 }
 0x723   : > { %v980_v27 = vmul.f32 %v979_v26, %v1735_v42 }
 0x725   : > { %990 = vrot.lane.b32.xlu0 %v980_v27, %s1484_s26  ;;  %v986_v0 = vrot.slane %v980_v27, 1  ;;  %v982_v29 = vrot.slane %v980_v27, 7  ;;  %s1423_s26 = sshll.u32 %s1485_s25, 4  ;;  %s1424_s26 = int_to_ptr.vmem [resolvable:$false] %s1423_s26 }
 0x726   : > { %s1425_s9 = scalar_lea.vmem %s1424_s26, 32  ;;  %p1426_p0 = scmp.lt.s32.totalorder %s1123_s18, %s1424_s26 }
 0x727   : > { %v989_v28 = vsel %vm988_vm4, %v986_v0, 0.0  ;;  %v985_v31 = vsel %vm984_vm5, 0.0, %v982_v29  ;;  %p1427_p1 = scmp.lt.s32.totalorder %s1425_s9, %s1419_s24 }
 0x728   : > { %1222 = vmatprep.mubr.msk.f32.mxu1 %vm354_vm1, %v989_v28 }
 0x729   : > { %p1428_p2 = por %p1427_p1, %p1426_p0 }
 0x72b   : > { %p1429_p3 = pnand %p1428_p2, %p1422_p13 }
 0x797   : > { %v991_v30 = vpop.permute.xlu0 %990 }
 0x798   : > { %v993_v32 = vsel %vm354_vm1, %v985_v31, %v991_v30 }
 0x799   : > { %1093 = vmatmul.mubr.f32.vlgmr.msra.gmra.mxu1 %v993_v32 }
 0x859   : > { %v1094_v34 = vpop.f32.mrf.mxu1 }
 0x85a   : > { %v1095_v35 = vadd.f32 %v1221_v33, %v1094_v34 }
 0x85b   : > { %v1096_v36 = vpop.f32.mrf.mxu1 }
 0x85c   : > { %v1098_v37 = vmax.f32 %v1095_v35, 0.0 }
 0x85e   : > { %v1100_v38 = vsel %vm1099_vm6, %v1098_v37, -inf }
 0x85f   : > { %v1101_v39 = vrot.slane %v1100_v38, 4 }
 0x861   : > { %v1102_v40 = vmax.f32 %v1100_v38, %v1101_v39 }
 0x863   : > { %v1103_v41 = vrot.slane %v1102_v40, 2 }
 0x865   : > { %v1104_v42 = vmax.f32 %v1102_v40, %v1103_v41 }
 0x867   : > { %v1105_v43 = vrot.slane %v1104_v42, 1 }
 0x869   : > { %v1106_v44 = vmax.f32 %v1104_v42, %v1105_v43 }
 0x86b   : > { %1108 = vst.msk [vmem:[%s321_s13] sm:$0x1] %vm1107_vm7, %v1106_v44 }
 0x86c   : > { %1432 = shalt.err (!%p1429_p3)
}
 0x86d   : > { %s1433_s10 = scalar_lea.hbm %s1120_s22, 16  ;;  %s1437_s12 = scalar_lea.hbm %s1919_s8, 32 }
 0x86e   : > { %p1434_p4 = scmp.ne.s32.totalorder %s1120_s22, %s1433_s10  ;;  %p1438_p9 = scmp.lt.s32.totalorder %s1120_s22, %s1919_s8 }
 0x86f   : > { %p1439_p10 = scmp.lt.s32.totalorder %s1437_s12, %s1433_s10 }
 0x870   : > { %p1435_p7 = pnand %p1434_p4, %p1569_p5 }
 0x871   : > { %p1440_p11 = por %p1439_p10, %p1438_p9 }
 0x872   : > { %p1436_p8 = pneg %p1435_p7 }
 0x874   : > { %p1441_p12 = pnand %p1440_p11, %p1436_p8 }
 0x876   : > { %1444 = shalt.err (!%p1441_p12)
}
 0x877   : > { %1366 = dma.vmem_to_hbm [thread:$0]  (%p1569_p5), %s1123_s18, 16, %s1120_s22, %s1110_s23  }
 0x878 PF: > { %p1372_p13 = scmp.ge.s32.totalorder %s1479_s30, 2  ;;  %s1134_s21 = sand.u32 1, %s1467_s27  }
 0x879   : > { %s1135_s24 = scalar_lea.sflag [#allocation3], %s1134_s21 }
 0x87a   : > { %p1369_p0 = pnand %p1372_p13, %p1573_p6 }
 0x87c   : > { %p1370_p1 = pneg %p1369_p0 }
 0x87e   : > { %1462 = dma.done.wait (%p1370_p1), %s1135_s24, 16  }
 0x87f   : > { %1464 = vsyncadd (%p1370_p1), %s1135_s24, 4294967280  ;;  %p18_p2 = scmp.ge.s32.totalorder %s1556_s11, 4   ;;  %s1922_s27 = smov %s1471_s28 }
 0x880   : > { %s1923_s28 = smov %s1475_s29  ;;  %s1924_s29 = smov %s1567_s14 }
 0x881   : > { %s1925_s30 = smov %s1556_s11  ;;  %20 = sbr.rel (!%p18_p2) target bundleno = 3 (0x3), region = 93 }
 0x886   :  { %1139 = vsyncpa [#allocation3], 1 }
 0x887   :  { %1141 = vsyncpa [#allocation3 + $0x1], 1 }

// kernel: tnet_lf_unit_forward.2
= control target key start
LH: loop header
LB: loop body
LE: loop exit
PB: predicated region body
PF: predicated region fallthrough
CT: control target
= control target key end

     0   :  { %vm35_vm0 = vcmask 254976   ;;  %v970_v2 = vmov 0.0   ;;  %s1090_s27 = smov 0   ;;  %s1285_s0 = inlined_call_operand.vmem [shape: f32[8,2,256], index: 0, kind: input, shape index: {}]   ;;  %s1286_s1 = inlined_call_operand.vmem [shape: f32[4,2,256], index: 1, kind: input, shape index: {}]   ;;  %s1287_s2 = inlined_call_operand.vmem [shape: s32[2,1], index: 2, kind: input, shape index: {}]   ;;  %s1288_s3 = inlined_call_operand.vmem [shape: s32[2,1], index: 3, kind: input, shape index: {}]   ;;  %s1289_s4 = inlined_call_operand.vmem [shape: f32[32,128], index: 4, kind: input, shape index: {}]   ;;  %s1290_s5 = inlined_call_operand.vmem [shape: f32[32,128], index: 5, kind: input, shape index: {}]   ;;  %s1291_s6 = inlined_call_operand.vmem [shape: f32[32,128], index: 6, kind: input, shape index: {}]   ;;  %s1292_s7 = inlined_call_operand.vmem [shape: f32[32,128], index: 7, kind: input, shape index: {}]   ;;  %s1293_s8 = inlined_call_operand.vmem [shape: f32[8,2,32], index: 8, kind: output, shape index: {0}]   ;;  %s1294_s9 = inlined_call_operand.vmem [shape: f32[8,2,32], index: 9, kind: output, shape index: {1}]   ;;  %s1295_s10 = inlined_call_operand.vmem [shape: f32[4,2,32], index: 10, kind: output, shape index: {2}]   ;;  %s1296_s11 = inlined_call_operand.vmem [shape: f32[4,2,32], index: 11, kind: output, shape index: {3}]  }
   0x1   :  { %v1059_v0 = vld [vmem:[%s1287_s2] sm:$0x3]  ;;  %36 = vst.msk [vmem:[#allocation2] sm:$0x3] %vm35_vm0, %v970_v2  ;;  %37 = vst.msk [vmem:[#allocation3] sm:$0x3] %vm35_vm0, %v970_v2 }
   0x2   :  { %v1064_v1 = vld [vmem:[%s1288_s3] sm:$0x3]  ;;  %v1078_v4 = vld [vmem:[%s1289_s4 + $0x8] sm:$0xff]  ;;  %v1083_v5 = vld [vmem:[%s1289_s4 + $0x10] sm:$0xff] }
   0x3   :  { %v1073_v3 = vld [vmem:[%s1289_s4] sm:$0xff]  ;;  %v1088_v6 = vld [vmem:[%s1289_s4 + $0x18] sm:$0xff] }
   0x4 LB: > { %v971_v7 = vmov 0.0   ;;  %vm972_vm1 = vmmov 0   ;;  %vm53_vm2 = vcmask 261120   ;;  %s776_s4 = sshll.u32 %s956_s27, 2  ;;  %s973_s12 = smov 64   ;;  %v164_v21 = vstv %s956_s27  ;;  %s956_s27 = sphi %s1090_s27, %s47_s27  }
   0x5   : > { %800 = vmatprep.subr.mxu0 %v971_v7  ;;  %808 = vmatprep.mubr.msk.f32.mxu0 %vm972_vm1, %v971_v7  ;;  %s50_s30 = scalar_lea.vmem %s1285_s0, %s776_s4  ;;  %s974_s13 = smov 32   ;;  %v975_v22 = vmov 0   ;;  %vm165_vm3 = vcmp.gt.s32.totalorder %v1059_v0, %v164_v21  ;;  %v976_v29 = vmov 1983009808   ;;  %v175_v31 = vlaneseq }
   0x6   : > { %801 = vmatpush3.msra.mxu0 %v1088_v6  ;;  %v51_v9 = vld [vmem:[%s50_s30] sm:$0xf]  ;;  %902 = vset.pattern.permute.xlu0 %v975_v22  ;;  %v166_v23 = vsel %vm165_vm3, 1, %v975_v22  ;;  %v173_v30 = vunpack.c.l.s4 %v976_v29  ;;  %s977_s14 = smov 96   ;;  %s756_s15 = sshll.u32 %s956_s27, 1 }
   0x7   : > { %802 = vmatprep.subr.mxu0 %v971_v7  ;;  %v176_v33 = vshrl.u32 %v175_v31, 7  ;;  %s199_s18 = scalar_lea.vmem %s1293_s8, %s756_s15  ;;  %s47_s27 = sadd.s32 1, %s956_s27  }
   0x8   : > { %803 = vmatpush3.msra.mxu0 %v1083_v5  ;;  %v52_v8 = vld [vmem:[#allocation2] sm:$0x3]  ;;  %v760_v14 = vld.sshfl [vmem:[#allocation3] sm:$0x3 pattern:$0x76325410]  ;;  %v174_v32 = vunpack.c.0.s8 %v173_v30 }
   0x9   : > { %804 = vmatprep.subr.mxu0 %v971_v7  ;;  %v184_v43 = vld [vmem:[#allocation3] sm:$0x3]  ;;  %p44_p0 = scmp.ge.s32.totalorder %s47_s27, 8  }
   0xa   : > { %805 = vmatpush3.msra.mxu0 %v1078_v4  ;;  %v1108_v35 = vsub.s32 %v174_v32, %v176_v33  ;;  %v1130_v46 = vld [vmem:[%s1290_s5] sm:$0xff] (%p44_p0)  ;;  %v1135_v47 = vld [vmem:[%s1290_s5 + $0x8] sm:$0xff] (%p44_p0)  ;;  %v1140_v48 = vld [vmem:[%s1290_s5 + $0x10] sm:$0xff] (%p44_p0)  ;;  %s1147_s3 = smov (%p44_p0), 0  }
   0xb   : > { %806 = vmatprep.subr.mxu0 %v971_v7  ;;  %v1145_v49 = vld [vmem:[%s1290_s5 + $0x18] sm:$0xff] (%p44_p0) }
   0xc   : > { %807 = vmatpush3.msra.mxu0 %v1073_v3 }
   0xd   : > { %809 = vmatmul.mubr.msk.f32.vlgmr.msra.gmra.mxu0 %vm53_vm2, %v52_v8 }
  0xcd   : > { %v123_v10 = vpop.f32.mrf.mxu0 }
  0xce   : > { %v127_v11 = vadd.f32 %v123_v10, %v51_v9 }
  0xcf   : > { %v810_v12 = vpop.f32.mrf.mxu0 }
  0xd0   : > { %903 = vtanh.f32 %v127_v11  ;;  %v759_v15 = vmul.f32 -1.442695, %v127_v11 }
  0xd2   : > { %905 = vpow2.f32 %v759_v15 }
  0xdd   : > { %v904_v13 = vpop.eup %903 }
  0xde   : > { %149 = vrot.lane.b32.xlu0 %v904_v13, %s973_s12 }
  0xdf   : > { %v906_v16 = vpop.eup %905 }
  0xe0   : > { %v131_v17 = vadd.f32 1.0, %v906_v16 }
  0xe2   : > { %144 = vrot.lane.b32.xlu0 %v760_v14, %s974_s13  ;;  %907 = vrcp.f32 %v131_v17 }
  0xe6   : > { %168 = vperm.xlu0 %902, %v166_v23  }
  0xef   : > { %v908_v18 = vpop.eup %907 }
 0x150   : > { %v150_v19 = vpop.permute.xlu0 %149 }
 0x151   : > { %v152_v20 = vmul.f32 %v908_v18, %v150_v19 }
 0x153   : > { %154 = vrot.lane.b32.xlu1 %v152_v20, %s974_s13 }
 0x154   : > { %v145_v24 = vpop.permute.xlu0 %144 }
 0x155   : > { %v147_v25 = vmul.f32 %v908_v18, %v145_v24 }
 0x161   : > { %v169_v39 = vpop.permute.xlu0 %168 }
 0x162   : > { %vm170_vm4 = vcmp.eq.s32.totalorder %v169_v39, 1 }
 0x1c5   : > { %v155_v26 = vpop.permute.xlu1 %154 }
 0x1c6   : > { %v157_v27 = vadd.f32 %v155_v26, %v147_v25 }
 0x1c8   : > { %909 = vtanh.f32 %v157_v27  ;;  %v192_v38 = vrot.slane %v157_v27, %v1108_v35 }
 0x1d5   : > { %v910_v28 = vpop.eup %909 }
 0x1d6   : > { %160 = vrot.lane.b32.xlu1 %v910_v28, %s973_s12 }
 0x248   : > { %v161_v34 = vpop.permute.xlu1 %160 }
 0x249   : > { %v163_v36 = vmul.f32 %v908_v18, %v161_v34 }
 0x24b   : > { %v178_v37 = vrot.slane %v163_v36, %v1108_v35 }
 0x24d   : > { %179 = vrot.lane.b32.xlu1 %v178_v37, %s974_s13 }
 0x251   : > { %193 = vrot.lane.b32.xlu1 %v192_v38, %s977_s14 }
 0x2bf   : > { %v180_v40 = vpop.permute.xlu1 %179 }
 0x2c0   : > { %v182_v41 = vsel %vm170_vm4, %v180_v40, %v52_v8  ;;  %v198_v42 = vsel %vm170_vm4, %v180_v40, 0.0 }
 0x2c1   : > { %183 = vst.msk [vmem:[#allocation2] sm:$0x3] %vm35_vm0, %v182_v41  ;;  %200 = vst.msk [vmem:[%s199_s18] sm:$0x3] %vm35_vm0, %v198_v42 }
 0x2c2   :  { %46 = sbr.rel (!%p44_p0) target bundleno = 4 (0x4), region = 112  ;;  %201 = vst.msk [vmem:[#allocation2] sm:$0x3] (%p44_p0), %vm35_vm0, %v970_v2 }
 0x2c3   : > { %v194_v44 = vpop.permute.xlu1 %193 }
 0x2c4   : > { %v196_v45 = vsel %vm170_vm4, %v194_v44, %v184_v43 }
 0x2c5   : > { %197 = vst.msk [vmem:[#allocation3] sm:$0x3] %vm35_vm0, %v196_v45 }
 0x2c6   :  { %202 = vst.msk [vmem:[#allocation3] sm:$0x3] (%p44_p0), %vm35_vm0, %v970_v2 }
 0x2c7 LB: > { %v978_v50 = vmov 0.0   ;;  %vm979_vm5 = vmmov 0   ;;  %s1158_s5 = ssub.s32 7, %s960_s3  ;;  %s980_s28 = smov 64   ;;  %v982_v5 = vmov 0   ;;  %s960_s3 = sphi %s1147_s3, %s212_s3  }
 0x2c8   : > { %811 = vmatprep.subr.mxu0 %v978_v50  ;;  %819 = vmatprep.mubr.msk.f32.mxu0 %vm979_vm5, %v978_v50  ;;  %s777_s25 = sshll.u32 %s1158_s5, 2  ;;  %s981_s29 = smov 32   ;;  %v333_v4 = vstv %s1158_s5 }
 0x2c9   : > { %812 = vmatpush3.msra.mxu0 %v1145_v49  ;;  %v218_v51 = vld [vmem:[#allocation2] sm:$0x3]  ;;  %s216_s4 = scalar_lea.vmem %s1285_s0, %s777_s25  ;;  %911 = vset.pattern.permute.xlu0 %v982_v5  ;;  %vm334_vm6 = vcmp.gt.s32.totalorder %v1059_v0, %v333_v4  ;;  %s983_s30 = smov 96  }
 0x2ca   : > { %813 = vmatprep.subr.mxu0 %v978_v50  ;;  %v217_v52 = vld [vmem:[%s216_s4] sm:$0xf]  ;;  %v335_v6 = vsel %vm334_vm6, 1, %v982_v5  ;;  %s761_s12 = sshll.u32 %s1158_s5, 1  ;;  %s212_s3 = sadd.s32 1, %s960_s3  }
 0x2cb   : > { %814 = vmatpush3.msra.mxu0 %v1140_v48  ;;  %v294_v53 = vrot.slane %v217_v52, 2  ;;  %s368_s15 = scalar_lea.vmem %s1294_s9, %s761_s12  ;;  %p209_p1 = scmp.ge.s32.totalorder %s212_s3, 8  }
 0x2cc   : > { %815 = vmatprep.subr.mxu0 %v978_v50  ;;  %v1185_v23 = vld [vmem:[%s1291_s6] sm:$0xff] (%p209_p1)  ;;  %v1190_v24 = vld [vmem:[%s1291_s6 + $0x8] sm:$0xff] (%p209_p1)  ;;  %v1195_v25 = vld [vmem:[%s1291_s6 + $0x10] sm:$0xff] (%p209_p1)  ;;  %s1202_s22 = smov (%p209_p1), 0  }
 0x2cd   : > { %816 = vmatpush3.msra.mxu0 %v1135_v47  ;;  %v765_v58 = vld.sshfl [vmem:[#allocation3] sm:$0x3 pattern:$0x76325410]  ;;  %v1200_v0 = vld [vmem:[%s1291_s6 + $0x18] sm:$0xff] (%p209_p1) }
 0x2ce   : > { %817 = vmatprep.subr.mxu0 %v978_v50  ;;  %v353_v20 = vld [vmem:[#allocation3] sm:$0x3] }
 0x2cf   : > { %818 = vmatpush3.msra.mxu0 %v1130_v46 }
 0x2d0   : > { %820 = vmatmul.mubr.msk.f32.vlgmr.msra.gmra.mxu0 %vm53_vm2, %v218_v51 }
 0x390   : > { %v289_v54 = vpop.f32.mrf.mxu0 }
 0x391   : > { %v296_v55 = vadd.f32 %v294_v53, %v289_v54 }
 0x392   : > { %v821_v56 = vpop.f32.mrf.mxu0 }
 0x393   : > { %912 = vtanh.f32 %v296_v55  ;;  %v764_v59 = vmul.f32 -1.442695, %v296_v55 }
 0x395   : > { %914 = vpow2.f32 %v764_v59 }
 0x3a0   : > { %v913_v57 = vpop.eup %912 }
 0x3a1   : > { %318 = vrot.lane.b32.xlu0 %v913_v57, %s980_s28 }
 0x3a2   : > { %v915_v60 = vpop.eup %914 }
 0x3a3   : > { %v300_v61 = vadd.f32 1.0, %v915_v60 }
 0x3a5   : > { %313 = vrot.lane.b32.xlu0 %v765_v58, %s981_s29  ;;  %916 = vrcp.f32 %v300_v61 }
 0x3a9   : > { %337 = vperm.xlu0 %911, %v335_v6  }
 0x3b2   : > { %v917_v62 = vpop.eup %916 }
 0x413   : > { %v319_v63 = vpop.permute.xlu0 %318 }
 0x414   : > { %v321_v3 = vmul.f32 %v917_v62, %v319_v63 }
 0x416   : > { %323 = vrot.lane.b32.xlu1 %v321_v3, %s981_s29 }
 0x417   : > { %v314_v7 = vpop.permute.xlu0 %313 }
 0x418   : > { %v316_v8 = vmul.f32 %v917_v62, %v314_v7 }
 0x424   : > { %v338_v16 = vpop.permute.xlu0 %337 }
 0x425   : > { %vm339_vm7 = vcmp.eq.s32.totalorder %v338_v16, 1 }
 0x488   : > { %v324_v9 = vpop.permute.xlu1 %323 }
 0x489   : > { %v326_v10 = vadd.f32 %v324_v9, %v316_v8 }
 0x48b   : > { %918 = vtanh.f32 %v326_v10  ;;  %v361_v15 = vrot.slane %v326_v10, %v1108_v35 }
 0x498   : > { %v919_v11 = vpop.eup %918 }
 0x499   : > { %329 = vrot.lane.b32.xlu1 %v919_v11, %s980_s28 }
 0x50b   : > { %v330_v12 = vpop.permute.xlu1 %329 }
 0x50c   : > { %v332_v13 = vmul.f32 %v917_v62, %v330_v12 }
 0x50e   : > { %v347_v14 = vrot.slane %v332_v13, %v1108_v35 }
 0x510   : > { %348 = vrot.lane.b32.xlu1 %v347_v14, %s981_s29 }
 0x514   : > { %362 = vrot.lane.b32.xlu1 %v361_v15, %s983_s30 }
 0x582   : > { %v349_v17 = vpop.permute.xlu1 %348 }
 0x583   : > { %v351_v18 = vsel %vm339_vm7, %v349_v17, %v218_v51  ;;  %v367_v19 = vsel %vm339_vm7, %v349_v17, 0.0 }
 0x584   : > { %352 = vst.msk [vmem:[#allocation2] sm:$0x3] %vm35_vm0, %v351_v18  ;;  %369 = vst.msk [vmem:[%s368_s15] sm:$0x3] %vm35_vm0, %v367_v19 }
 0x585   :  { %370 = vst.msk [vmem:[#allocation2] sm:$0x3] (%p209_p1), %vm35_vm0, %v970_v2 }
 0x586   : > { %v363_v21 = vpop.permute.xlu1 %362 }
 0x587   : > { %v365_v22 = vsel %vm339_vm7, %v363_v21, %v353_v20  ;;  %211 = sbr.rel (!%p209_p1) target bundleno = 711 (0x2c7), region = 123 }
 0x588   : > { %366 = vst.msk [vmem:[#allocation3] sm:$0x3] %vm35_vm0, %v365_v22 }
 0x589   :  { %371 = vst.msk [vmem:[#allocation3] sm:$0x3] (%p209_p1), %vm35_vm0, %v970_v2 }
 0x58c LB: > { %v984_v26 = vmov 0.0   ;;  %vm985_vm8 = vmmov 0   ;;  %v386_v27 = vld [vmem:[#allocation2] sm:$0x3]  ;;  %s778_s6 = sshll.u32 %s964_s22, 2  ;;  %s986_s24 = smov 64   ;;  %v498_v41 = vstv %s964_s22  ;;  %s964_s22 = sphi %s1202_s22, %s381_s22  }
 0x58d   : > { %822 = vmatprep.subr.mxu0 %v984_v26  ;;  %830 = vmatprep.mubr.msk.f32.mxu0 %vm985_vm8, %v984_v26  ;;  %s384_s8 = scalar_lea.vmem %s1286_s1, %s778_s6  ;;  %s987_s3 = smov 32   ;;  %v988_v42 = vmov 0   ;;  %vm499_vm9 = vcmp.gt.s32.totalorder %v1064_v1, %v498_v41 }
 0x58e   : > { %823 = vmatpush3.msra.mxu0 %v1200_v0  ;;  %v385_v28 = vld [vmem:[%s384_s8] sm:$0xf]  ;;  %920 = vset.pattern.permute.xlu0 %v988_v42  ;;  %v500_v43 = vsel %vm499_vm9, 1, %v988_v42  ;;  %s989_s5 = smov 96   ;;  %s766_s25 = sshll.u32 %s964_s22, 1 }
 0x58f   : > { %824 = vmatprep.subr.mxu0 %v984_v26  ;;  %s533_s4 = scalar_lea.vmem %s1295_s10, %s766_s25  ;;  %s381_s22 = sadd.s32 1, %s964_s22  }
 0x590   : > { %825 = vmatpush3.msra.mxu0 %v1195_v25  ;;  %v770_v33 = vld.sshfl [vmem:[#allocation3] sm:$0x3 pattern:$0x76325410]  ;;  %p378_p2 = scmp.ge.s32.totalorder %s381_s22, 4  }
 0x591   : > { %826 = vmatprep.subr.mxu0 %v984_v26  ;;  %v518_v57 = vld [vmem:[#allocation3] sm:$0x3]  ;;  %v1242_v61 = vld [vmem:[%s1292_s7 + $0x8] sm:$0xff] (%p378_p2)  ;;  %v1247_v62 = vld [vmem:[%s1292_s7 + $0x10] sm:$0xff] (%p378_p2)  ;;  %s1254_s16 = smov (%p378_p2), 0  }
 0x592   : > { %827 = vmatpush3.msra.mxu0 %v1190_v24  ;;  %v1237_v60 = vld [vmem:[%s1292_s7] sm:$0xff] (%p378_p2)  ;;  %v1252_v63 = vld [vmem:[%s1292_s7 + $0x18] sm:$0xff] (%p378_p2) }
 0x593   : > { %828 = vmatprep.subr.mxu0 %v984_v26 }
 0x594   : > { %829 = vmatpush3.msra.mxu0 %v1185_v23 }
 0x595   : > { %831 = vmatmul.mubr.msk.f32.vlgmr.msra.gmra.mxu0 %vm53_vm2, %v386_v27 }
 0x655   : > { %v457_v29 = vpop.f32.mrf.mxu0 }
 0x656   : > { %v461_v30 = vadd.f32 %v457_v29, %v385_v28 }
 0x657   : > { %v832_v31 = vpop.f32.mrf.mxu0 }
 0x658   : > { %921 = vtanh.f32 %v461_v30  ;;  %v769_v34 = vmul.f32 -1.442695, %v461_v30 }
 0x65a   : > { %923 = vpow2.f32 %v769_v34 }
 0x665   : > { %v922_v32 = vpop.eup %921 }
 0x666   : > { %483 = vrot.lane.b32.xlu0 %v922_v32, %s986_s24 }
 0x667   : > { %v924_v36 = vpop.eup %923 }
 0x668   : > { %v465_v37 = vadd.f32 1.0, %v924_v36 }
 0x66a   : > { %478 = vrot.lane.b32.xlu0 %v770_v33, %s987_s3  ;;  %925 = vrcp.f32 %v465_v37 }
 0x66e   : > { %502 = vperm.xlu0 %920, %v500_v43  }
 0x677   : > { %v926_v38 = vpop.eup %925 }
 0x6d8   : > { %v484_v39 = vpop.permute.xlu0 %483 }
 0x6d9   : > { %v486_v40 = vmul.f32 %v926_v38, %v484_v39 }
 0x6db   : > { %488 = vrot.lane.b32.xlu1 %v486_v40, %s987_s3 }
 0x6dc   : > { %v479_v44 = vpop.permute.xlu0 %478 }
 0x6dd   : > { %v481_v45 = vmul.f32 %v926_v38, %v479_v44 }
 0x6e9   : > { %v503_v53 = vpop.permute.xlu0 %502 }
 0x6ea   : > { %vm504_vm10 = vcmp.eq.s32.totalorder %v503_v53, 1 }
 0x74d   : > { %v489_v46 = vpop.permute.xlu1 %488 }
 0x74e   : > { %v491_v47 = vadd.f32 %v489_v46, %v481_v45 }
 0x750   : > { %927 = vtanh.f32 %v491_v47  ;;  %v526_v52 = vrot.slane %v491_v47, %v1108_v35 }
 0x75d   : > { %v928_v48 = vpop.eup %927 }
 0x75e   : > { %494 = vrot.lane.b32.xlu1 %v928_v48, %s986_s24 }
 0x7d0   : > { %v495_v49 = vpop.permute.xlu1 %494 }
 0x7d1   : > { %v497_v50 = vmul.f32 %v926_v38, %v495_v49 }
 0x7d3   : > { %v512_v51 = vrot.slane %v497_v50, %v1108_v35 }
 0x7d5   : > { %513 = vrot.lane.b32.xlu1 %v512_v51, %s987_s3 }
 0x7d9   : > { %527 = vrot.lane.b32.xlu1 %v526_v52, %s989_s5 }
 0x847   : > { %v514_v54 = vpop.permute.xlu1 %513 }
 0x848   : > { %v516_v55 = vsel %vm504_vm10, %v514_v54, %v386_v27  ;;  %v532_v56 = vsel %vm504_vm10, %v514_v54, 0.0 }
 0x849   : > { %517 = vst.msk [vmem:[#allocation2] sm:$0x3] %vm35_vm0, %v516_v55  ;;  %534 = vst.msk [vmem:[%s533_s4] sm:$0x3] %vm35_vm0, %v532_v56 }
 0x84a   :  { %535 = vst.msk [vmem:[#allocation2] sm:$0x3] (%p378_p2), %vm35_vm0, %v970_v2 }
 0x84b   : > { %v528_v58 = vpop.permute.xlu1 %527 }
 0x84c   : > { %v530_v59 = vsel %vm504_vm10, %v528_v58, %v518_v57 }
 0x84d   : > { %531 = vst.msk [vmem:[#allocation3] sm:$0x3] %vm35_vm0, %v530_v59 }
 0x84e   :  { %380 = sbr.rel (!%p378_p2) target bundleno = 1420 (0x58c), region = 134  ;;  %536 = vst.msk [vmem:[#allocation3] sm:$0x3] (%p378_p2), %vm35_vm0, %v970_v2 }
 0x853 LB: > { %v990_v2 = vmov 0.0   ;;  %vm991_vm11 = vmmov 0   ;;  %v552_v3 = vld [vmem:[#allocation2] sm:$0x3]  ;;  %s1265_s7 = ssub.s32 3, %s968_s16  ;;  %s992_s21 = smov 64   ;;  %s968_s16 = sphi %s1254_s16, %s546_s16  }
 0x854   : > { %833 = vmatprep.subr.mxu0 %v990_v2  ;;  %841 = vmatprep.mubr.msk.f32.mxu0 %vm991_vm11, %v990_v2  ;;  %s779_s17 = sshll.u32 %s1265_s7, 2  ;;  %s993_s0 = smov 32   ;;  %v667_v17 = vstv %s1265_s7  ;;  %v994_v18 = vmov 0  }
 0x855   : > { %834 = vmatpush3.msra.mxu0 %v1252_v63  ;;  %s550_s20 = scalar_lea.vmem %s1286_s1, %s779_s17  ;;  %v775_v10 = vld.sshfl [vmem:[#allocation3] sm:$0x3 pattern:$0x76325410]  ;;  %929 = vset.pattern.permute.xlu0 %v994_v18  ;;  %vm668_vm12 = vcmp.gt.s32.totalorder %v1064_v1, %v667_v17  ;;  %s995_s9 = smov 96  }
 0x856   : > { %835 = vmatprep.subr.mxu0 %v990_v2  ;;  %v551_v4 = vld [vmem:[%s550_s20] sm:$0xf]  ;;  %v669_v19 = vsel %vm668_vm12, 1, %v994_v18  ;;  %s771_s22 = sshll.u32 %s1265_s7, 1  ;;  %s546_s16 = sadd.s32 1, %s968_s16  }
 0x857   : > { %836 = vmatpush3.msra.mxu0 %v1247_v62  ;;  %v628_v5 = vrot.slane %v551_v4, 2  ;;  %s702_s2 = scalar_lea.vmem %s1296_s11, %s771_s22  ;;  %v687_v32 = vld [vmem:[#allocation3] sm:$0x3]  ;;  %p543_p3 = scmp.ge.s32.totalorder %s546_s16, 4  }
 0x858   : > { %837 = vmatprep.subr.mxu0 %v990_v2 }
 0x859   : > { %838 = vmatpush3.msra.mxu0 %v1242_v61 }
 0x85a   : > { %839 = vmatprep.subr.mxu0 %v990_v2 }
 0x85b   : > { %840 = vmatpush3.msra.mxu0 %v1237_v60 }
 0x85c   : > { %842 = vmatmul.mubr.msk.f32.vlgmr.msra.gmra.mxu0 %vm53_vm2, %v552_v3 }
 0x91c   : > { %v623_v6 = vpop.f32.mrf.mxu0 }
 0x91d   : > { %v630_v7 = vadd.f32 %v628_v5, %v623_v6 }
 0x91e   : > { %v843_v8 = vpop.f32.mrf.mxu0 }
 0x91f   : > { %930 = vtanh.f32 %v630_v7  ;;  %v774_v11 = vmul.f32 -1.442695, %v630_v7 }
 0x921   : > { %932 = vpow2.f32 %v774_v11 }
 0x92c   : > { %v931_v9 = vpop.eup %930 }
 0x92d   : > { %652 = vrot.lane.b32.xlu0 %v931_v9, %s992_s21 }
 0x92e   : > { %v933_v12 = vpop.eup %932 }
 0x92f   : > { %v634_v13 = vadd.f32 1.0, %v933_v12 }
 0x931   : > { %647 = vrot.lane.b32.xlu0 %v775_v10, %s993_s0  ;;  %934 = vrcp.f32 %v634_v13 }
 0x935   : > { %671 = vperm.xlu0 %929, %v669_v19  }
 0x93e   : > { %v935_v14 = vpop.eup %934 }
 0x99f   : > { %v653_v15 = vpop.permute.xlu0 %652 }
 0x9a0   : > { %v655_v16 = vmul.f32 %v935_v14, %v653_v15 }
 0x9a2   : > { %657 = vrot.lane.b32.xlu1 %v655_v16, %s993_s0 }
 0x9a3   : > { %v648_v20 = vpop.permute.xlu0 %647 }
 0x9a4   : > { %v650_v21 = vmul.f32 %v935_v14, %v648_v20 }
 0x9b0   : > { %v672_v28 = vpop.permute.xlu0 %671 }
 0x9b1   : > { %vm673_vm13 = vcmp.eq.s32.totalorder %v672_v28, 1 }
 0xa14   : > { %v658_v22 = vpop.permute.xlu1 %657 }
 0xa15   : > { %v660_v23 = vadd.f32 %v658_v22, %v650_v21 }
 0xa17   : > { %936 = vtanh.f32 %v660_v23  ;;  %v695_v27 = vrot.slane %v660_v23, %v1108_v35 }
 0xa24   : > { %v937_v24 = vpop.eup %936 }
 0xa25   : > { %663 = vrot.lane.b32.xlu1 %v937_v24, %s992_s21 }
 0xa97   : > { %v664_v25 = vpop.permute.xlu1 %663 }
 0xa98   : > { %v666_v0 = vmul.f32 %v935_v14, %v664_v25 }
 0xa9a   : > { %v681_v26 = vrot.slane %v666_v0, %v1108_v35 }
 0xa9c   : > { %682 = vrot.lane.b32.xlu1 %v681_v26, %s993_s0 }
 0xaa0   : > { %696 = vrot.lane.b32.xlu1 %v695_v27, %s995_s9 }
 0xb0e   : > { %v683_v29 = vpop.permute.xlu1 %682 }
 0xb0f   : > { %v685_v30 = vsel %vm673_vm13, %v683_v29, %v552_v3  ;;  %v701_v31 = vsel %vm673_vm13, %v683_v29, 0.0 }
 0xb10   : > { %686 = vst.msk [vmem:[#allocation2] sm:$0x3] %vm35_vm0, %v685_v30  ;;  %703 = vst.msk [vmem:[%s702_s2] sm:$0x3] %vm35_vm0, %v701_v31 }
 0xb12   : > { %v697_v33 = vpop.permute.xlu1 %696 }
 0xb13   : > { %v699_v34 = vsel %vm673_vm13, %v697_v33, %v687_v32 }
 0xb14   : > { %700 = vst.msk [vmem:[#allocation3] sm:$0x3] %vm35_vm0, %v699_v34 }
 0xb15   :  { %545 = sbr.rel (!%p543_p3) target bundleno = 2131 (0x853), region = 145 }

</bundles_post_ra>
